<compile_context>
chip_gen: v5e
topology: v5e:2x2
jax: 0.10.0
libtpu: 0.0.40
codegen_flags: <defaults>
</compile_context>

<pallas_src>
import functools

import jax
import jax.numpy as jnp
from jax.experimental import pallas as pl
from jax.experimental.pallas import tpu as pltpu


def _simple_cls_kernel(x_ref, w_ref, o_ref, *, group_size: int):
    # Linear (no bias): y = x @ W.T with W in PyTorch (out_features, in_features)
    # layout; contract x dim 1 against w dim 1 so no transpose is ever needed.
    y = jax.lax.dot_general(
        x_ref[...],
        w_ref[...],
        dimension_numbers=(((1,), (1,)), ((), ())),
        preferred_element_type=jnp.float32,
    )

    tb, c = y.shape
    num_groups = c // group_size

    # SimNorm: softmax within each contiguous group of `group_size` channels,
    # vectorized across all groups at once (single reduce pair, single store).
    yg = y.reshape(tb, num_groups, group_size)
    m = jnp.max(yg, axis=-1, keepdims=True)
    e = jnp.exp(yg - m)
    denom = jnp.sum(e, axis=-1, keepdims=True)
    out = e * pl.reciprocal(denom, approx=True)  # EUP slot, free alongside exp

    o_ref[...] = out.reshape(tb, c).astype(o_ref.dtype)


def simple_classification_model(x, weight, group_size, *, block_b=None):
    """x: (B, C); weight: (C, C) in PyTorch Linear layout (out, in); no bias."""
    B, C = x.shape
    assert weight.shape == (C, C)
    assert C % group_size == 0

    # Batch tile: as large as reasonable, multiple of 8 sublanes (or full B).
    if block_b is None:
        block_b = min(B, 512)
    if B % 8 == 0:
        block_b = max(8, block_b - (block_b % 8))
    else:
        block_b = B  # full-array block: (8,128) constraint is relaxed
    grid = (pl.cdiv(B, block_b),)

    # Raise the scoped VMEM limit only when the resident weight plus the
    # double-buffered x/out tiles would not fit the per-generation defaults.
    # NOTE: for large C, cast weight (and x) to bf16 before calling to halve
    # the VMEM/DMA footprint and hit the bf16 MXU rate (accum stays f32).
    itemsize = jnp.dtype(x.dtype).itemsize
    w_bytes = C * C * jnp.dtype(weight.dtype).itemsize
    act_bytes = 2 * 2 * block_b * C * itemsize  # x + out, double-buffered
    needed = w_bytes + act_bytes
    cp_kwargs = dict(dimension_semantics=("parallel",))
    if needed > 24 * 1024 * 1024:
        cp_kwargs["vmem_limit_bytes"] = min(int(needed * 1.5), 64 * 1024 * 1024)

    kernel = functools.partial(_simple_cls_kernel, group_size=group_size)
    return pl.pallas_call(
        kernel,
        out_shape=jax.ShapeDtypeStruct((B, C), x.dtype),
        grid=grid,
        in_specs=[
            pl.BlockSpec((block_b, C), lambda i: (i, 0)),
            pl.BlockSpec((C, C), lambda i: (0, 0)),  # weight resident in VMEM
        ],
        out_specs=pl.BlockSpec((block_b, C), lambda i: (i, 0)),
        compiler_params=pltpu.CompilerParams(**cp_kwargs),
    )(x, weight)


def _reference(x, weight, group_size):
    y = x @ weight.T
    B, C = y.shape
    yg = y.reshape(B, C // group_size, group_size)
    yg = jax.nn.softmax(yg, axis=-1)
    return yg.reshape(B, C)


if __name__ == "__main__":
    batch = 16
    channels = 128
    group_size = 8

    key = jax.random.PRNGKey(0)
    kx, kw = jax.random.split(key)
    x = jax.random.normal(kx, (batch, channels), dtype=jnp.float32)
    # Deterministic "init" of the Linear weight (PyTorch layout: (out, in)).
    bound = 1.0 / (channels ** 0.5)
    weight = jax.random.uniform(
        kw, (channels, channels), dtype=jnp.float32, minval=-bound, maxval=bound
    )

    out = simple_classification_model(x, weight, group_size)
    out = jax.block_until_ready(out)

    ref = _reference(x, weight, group_size)
    assert out.shape == (batch, channels)
    # Slightly relaxed tolerance to account for the EUP approx reciprocal.
    assert jnp.allclose(out, ref, atol=2e-3, rtol=2e-3), float(
        jnp.max(jnp.abs(out - ref))
    )

    print("KERNEL_OK")
</pallas_src>

<mosaic_0001>
module attributes {stable_mosaic.version = 11 : i64} {
  func.func @_simple_cls_kernel(%arg0: i32, %arg1: memref<16x128xf32, #tpu.memory_space<vmem>>, %arg2: memref<128x128xf32, #tpu.memory_space<vmem>>, %arg3: memref<16x128xf32, #tpu.memory_space<vmem>>) attributes {dimension_semantics = [#tpu.dimension_semantics<parallel>], iteration_bounds = array<i64: 1>, scalar_prefetch = 0 : i64, scratch_operands = 0 : i64, tpu.core_type = #tpu.core_type<tc>, window_params = [{transform_indices = @transform_0, window_bounds = array<i64: 16, 128>}, {pipeline_mode = #tpu.pipeline_mode<synchronous>, transform_indices = @transform_1, window_bounds = array<i64: 128, 128>}, {transform_indices = @transform_2, window_bounds = array<i64: 16, 128>}]} {
    %c0 = arith.constant 0 : index
    %c0_0 = arith.constant 0 : index
    %0 = vector.load %arg1[%c0, %c0_0] : memref<16x128xf32, #tpu.memory_space<vmem>>, vector<16x128xf32>
    %c0_1 = arith.constant 0 : index
    %c0_2 = arith.constant 0 : index
    %1 = vector.load %arg2[%c0_1, %c0_2] : memref<128x128xf32, #tpu.memory_space<vmem>>, vector<128x128xf32>
    %cst = arith.constant dense<0.000000e+00> : vector<16x128xf32>
    %2 = tpu.matmul %0, %1, %cst {dimension_numbers = #tpu.dot_dimension_numbers<[1], [1], [0], [0], [0, 0, 1, 0], [], []>} : vector<16x128xf32>, vector<128x128xf32>, vector<16x128xf32> -> vector<16x128xf32>
    %3 = vector.shape_cast %2 : vector<16x128xf32> to vector<16x16x8xf32>
    %cst_3 = arith.constant dense<0xFF800000> : vector<16x16xf32>
    %4 = vector.multi_reduction <maximumf>, %3, %cst_3 [2] : vector<16x16x8xf32> to vector<16x16xf32>
    %5 = vector.shape_cast %4 : vector<16x16xf32> to vector<16x16x1xf32>
    %6 = vector.broadcast %5 : vector<16x16x1xf32> to vector<16x16x8xf32>
    %7 = arith.subf %3, %6 : vector<16x16x8xf32>
    %8 = math.exp %7 : vector<16x16x8xf32>
    %cst_4 = arith.constant dense<0.000000e+00> : vector<16x16xf32>
    %9 = vector.multi_reduction <add>, %8, %cst_4 [2] : vector<16x16x8xf32> to vector<16x16xf32>
    %10 = vector.shape_cast %9 : vector<16x16xf32> to vector<16x16x1xf32>
    %11 = tpu.reciprocal %10 {approx = true} : vector<16x16x1xf32> -> vector<16x16x1xf32>
    %12 = vector.broadcast %11 : vector<16x16x1xf32> to vector<16x16x8xf32>
    %13 = arith.mulf %8, %12 : vector<16x16x8xf32>
    %14 = vector.shape_cast %13 : vector<16x16x8xf32> to vector<16x128xf32>
    %c0_5 = arith.constant 0 : index
    %c0_6 = arith.constant 0 : index
    %15 = vector.load %arg3[%c0_5, %c0_6] : memref<16x128xf32, #tpu.memory_space<vmem>>, vector<16x128xf32>
    tpu.vector_store %arg3[%c0_5, %c0_6], %14 {strides = array<i32>} : memref<16x128xf32, #tpu.memory_space<vmem>>, vector<16x128xf32>,
    return
  }
  func.func @transform_0(%arg0: i32) -> (i32, i32) {
    %c0_i32 = arith.constant 0 : i32
    %c0_i32_0 = arith.constant 0 : i32
    return %arg0, %c0_i32 : i32, i32
  }
  func.func @transform_1(%arg0: i32) -> (i32, i32) {
    %c0_i32 = arith.constant 0 : i32
    %c0_i32_0 = arith.constant 0 : i32
    %c0_i32_1 = arith.constant 0 : i32
    return %c0_i32, %c0_i32_0 : i32, i32
  }
  func.func @transform_2(%arg0: i32) -> (i32, i32) {
    %c0_i32 = arith.constant 0 : i32
    %c0_i32_0 = arith.constant 0 : i32
    return %arg0, %c0_i32 : i32, i32
  }
}

</mosaic_0001>

<bundles_post_ra>
// kernel: tpu_custom_call.1
= control target key start
LH: loop header
LB: loop body
LE: loop exit
PB: predicated region body
PF: predicated region fallthrough
CT: control target
= control target key end

     0   :  { %7 = vsyncpa [#allocation3], 0  ;;  %s2919_s0 = inlined_call_operand.hbm [shape: f32[16,128], index: 0, kind: input, shape index: {}]   ;;  %s2920_s1 = inlined_call_operand.hbm [shape: f32[128,128], index: 1, kind: input, shape index: {}]   ;;  %s2921_s2 = inlined_call_operand.hbm [shape: f32[16,128], index: 2, kind: output, shape index: {}]  }
   0x1   :  { %8 = vsyncpa [#allocation6], 0 }
   0x2   :  { %9 = vsyncpa [#allocation4], 0  ;;  %s14_s11 = sshll.u32 %s2919_s0, 4  ;;  %s1856_s12 = smov [#allocation2]   ;;  %s15_s11 = int_to_ptr.hbm [resolvable:$true] %s14_s11 }
   0x3   :  { %s16_s13 = sshll.u32 %s1856_s12, 4  ;;  %s27_s16 = sshll.u32 %s2920_s1, 4  ;;  %s17_s13 = int_to_ptr.vmem [resolvable:$true] %s16_s13  ;;  %s28_s16 = int_to_ptr.hbm [resolvable:$true] %s27_s16 }
   0x4   :  { %s1857_s17 = smov 128   ;;  %s1858_s18 = smov 8  }
   0x5   :  { %22 = dma.hbm_to_vmem [thread:$0]  %s15_s11, 256, %s17_s13, [#allocation3], %s1857_s17, %s1857_s17, %s1858_s18  }
   0x6   :  { %s1859_s19 = smov [#allocation5]  }
   0x7   :  { %s29_s20 = sshll.u32 %s1859_s19, 4  ;;  %s30_s20 = int_to_ptr.vmem [resolvable:$true] %s29_s20 }
   0x8   :  { %35 = dma.hbm_to_vmem [thread:$0]  %s28_s16, 2048, %s30_s20, [#allocation6], %s1857_s17, %s1857_s17, %s1858_s18  }
   0x9   :  { %1850 = dma.done.wait [#allocation3], 256  }
   0xa   :  { %1851 = vsyncadd [#allocation3], 4294967040 }
   0xb   :  { %1852 = dma.done.wait [#allocation6], 2048  }
   0xc   :  { %1853 = vsyncadd [#allocation6], 4294965248  ;;  %v61_v0 = vld [vmem:[#allocation5 + $0x78] sm:$0xff]  ;;  %v60_v1 = vld [vmem:[#allocation5 + $0x70] sm:$0xff]  ;;  %s1860_s0 = smov 104   ;;  %s1861_s1 = smov 112  }
   0xd   :  { %62 = vmatpush.xpose.msra.mxu0 %v61_v0  ;;  %1613 = vmatpush.xpose.msra.mxu1 %v61_v0  ;;  %v59_v2 = vld [vmem:[#allocation5 + $0x68] sm:$0xff]  ;;  %v58_v3 = vld [vmem:[#allocation5 + $0x60] sm:$0xff]  ;;  %v57_v4 = vld [vmem:[#allocation5 + $0x58] sm:$0xff]  ;;  %s1862_s21 = smov 120   ;;  %s1863_s22 = smov 88   ;;  %vm178_vm0 = vcmask 1047556  }
   0xe   :  { %v56_v5 = vld [vmem:[#allocation5 + $0x50] sm:$0xff]  ;;  %v55_v6 = vld [vmem:[#allocation5 + $0x48] sm:$0xff]  ;;  %v54_v7 = vld [vmem:[#allocation5 + $0x40] sm:$0xff]  ;;  %s1864_s23 = smov 96   ;;  %s1865_s24 = smov 80   ;;  %vm626_vm1 = vcmask 64512  }
   0xf   :  { %v53_v8 = vld [vmem:[#allocation5 + $0x38] sm:$0xff]  ;;  %v52_v9 = vld [vmem:[#allocation5 + $0x30] sm:$0xff]  ;;  %v51_v10 = vld [vmem:[#allocation5 + $0x28] sm:$0xff]  ;;  %s1866_s25 = smov 64   ;;  %s1867_s26 = smov 72   ;;  %vm1549_vm2 = vcmask 130048  }
  0x10   :  { %v50_v11 = vld [vmem:[#allocation5 + $0x20] sm:$0xff]  ;;  %v49_v12 = vld [vmem:[#allocation5 + $0x18] sm:$0xff]  ;;  %v48_v13 = vld [vmem:[#allocation5 + $0x10] sm:$0xff]  ;;  %s1868_s27 = smov 56   ;;  %s1869_s28 = smov 40   ;;  %vm1552_vm3 = vcmask 195584  }
  0x11   :  { %63 = vmatpush.xpose.msra.mxu0 %v60_v1  ;;  %1614 = vmatpush.xpose.msra.mxu1 %v60_v1  ;;  %v47_v14 = vld [vmem:[#allocation5 + $0x8] sm:$0xff]  ;;  %v46_v15 = vld [vmem:[#allocation5] sm:$0xff]  ;;  %v44_v16 = vld [vmem:[#allocation2] sm:$0xff]  ;;  %s1870_s29 = smov 48   ;;  %s1871_s30 = smov 32   ;;  %vm1555_vm4 = vcmask 261120  }
  0x12   :  { %v45_v17 = vld [vmem:[#allocation2 + $0x8] sm:$0xff]  ;;  %s1872_s3 = smov 16   ;;  %s1873_s4 = smov 24   ;;  %v1874_v25 = vmov 1983009808   ;;  %vm1561_vm5 = vcmask 392192  }
  0x13   :  { %v183_v26 = vunpack.c.l.s4 %v1874_v25  ;;  %v1875_v62 = vmov 1934713408   ;;  %vm1558_vm6 = vcmask 326656   ;;  %vm1564_vm7 = vcmask 457728   ;;  %s1876_s5 = smov [#allocation7]   ;;  %s1599_s9 = sshll.u32 %s2921_s2, 4  ;;  %s1600_s9 = int_to_ptr.hbm [resolvable:$true] %s1599_s9 }
  0x14   :  { %v231_v63 = vunpack.c.l.s4 %v1875_v62  ;;  %vm1570_vm8 = vcmask 588800   ;;  %vm1567_vm9 = vcmask 523264   ;;  %vm1573_vm10 = vcmask 654336   ;;  %s1597_s6 = sshll.u32 %s1876_s5, 4  ;;  %s1598_s6 = int_to_ptr.vmem [resolvable:$true] %s1597_s6 }
  0x15   :  { %64 = vmatpush.xpose.msra.mxu0 %v59_v2  ;;  %1615 = vmatpush.xpose.msra.mxu1 %v59_v2  ;;  %v1970_v29 = vunpack.c.0.s8 %v183_v26  ;;  %vm1579_vm11 = vcmask 785408   ;;  %vm1576_vm12 = vcmask 719872   ;;  %vm1582_vm13 = vcmask 850944  }
  0x16   :  { %vm1588_vm14 = vcmask 982016   ;;  %vm1585_vm15 = vcmask 916480  }
  0x19   :  { %65 = vmatpush.xpose.msra.mxu0 %v58_v3  ;;  %1616 = vmatpush.xpose.msra.mxu1 %v58_v3 }
  0x1d   :  { %66 = vmatpush.xpose.msra.mxu0 %v57_v4  ;;  %1617 = vmatpush.xpose.msra.mxu1 %v57_v4 }
  0x21   :  { %67 = vmatpush.xpose.msra.mxu0 %v56_v5  ;;  %1618 = vmatpush.xpose.msra.mxu1 %v56_v5 }
  0x25   :  { %68 = vmatpush.xpose.msra.mxu0 %v55_v6  ;;  %1619 = vmatpush.xpose.msra.mxu1 %v55_v6 }
  0x29   :  { %69 = vmatpush.xpose.msra.mxu0 %v54_v7  ;;  %1620 = vmatpush.xpose.msra.mxu1 %v54_v7 }
  0x2d   :  { %70 = vmatpush.xpose.msra.mxu0 %v53_v8  ;;  %1621 = vmatpush.xpose.msra.mxu1 %v53_v8 }
  0x31   :  { %71 = vmatpush.xpose.msra.mxu0 %v52_v9  ;;  %1622 = vmatpush.xpose.msra.mxu1 %v52_v9 }
  0x35   :  { %72 = vmatpush.xpose.msra.mxu0 %v51_v10  ;;  %1623 = vmatpush.xpose.msra.mxu1 %v51_v10  ;;  %v2011_v10 = vunpack.c.0.s8 %v231_v63 }
  0x39   :  { %73 = vmatpush.xpose.msra.mxu0 %v50_v11  ;;  %1624 = vmatpush.xpose.msra.mxu1 %v50_v11 }
  0x3d   :  { %74 = vmatpush.xpose.msra.mxu0 %v49_v12  ;;  %1625 = vmatpush.xpose.msra.mxu1 %v49_v12 }
  0x41   :  { %75 = vmatpush.xpose.msra.mxu0 %v48_v13  ;;  %1626 = vmatpush.xpose.msra.mxu1 %v48_v13 }
  0x45   :  { %76 = vmatpush.xpose.msra.mxu0 %v47_v14  ;;  %1627 = vmatpush.xpose.msra.mxu1 %v47_v14 }
  0x49   :  { %77 = vmatpush.xpose.msra.mxu0 %v46_v15  ;;  %1628 = vmatpush.xpose.msra.mxu1 %v46_v15 }
  0x4c   :  { %78 = vmatmul.f32.vlgmr.msra.gmra.mxu0 %v44_v16  ;;  %81 = vmatmul.f32.vlgmr.msra.gmra.mxu1 %v45_v17 }
  0xc9   :  { %v1904_v18 = vpop.f32.mrf.mxu0  ;;  %v1912_v19 = vpop.f32.mrf.mxu1 }
  0xca   :  { %99 = vrot.lane.b32.xlu2 %v1904_v18, %s1860_s0  ;;  %93 = vrot.lane.b32.xlu1 %v1904_v18, %s1861_s1  ;;  %v404_v37 = vrot.slane %v1912_v19, 4  ;;  %v180_v47 = vrot.slane %v1904_v18, 4 }
  0xcb   :  { %87 = vrot.lane.b32.xlu0 %v1904_v18, %s1862_s21 }
  0xd2   :  { %101 = vrot.lane.b32.xlu2 %v1912_v19, %s1860_s0  ;;  %95 = vrot.lane.b32.xlu1 %v1912_v19, %s1861_s1 }
  0xd3   :  { %89 = vrot.lane.b32.xlu0 %v1912_v19, %s1862_s21 }
  0xda   :  { %111 = vrot.lane.b32.xlu2 %v1904_v18, %s1863_s22  ;;  %107 = vrot.lane.b32.xlu1 %v1912_v19, %s1864_s23 }
  0xdb   :  { %105 = vrot.lane.b32.xlu0 %v1904_v18, %s1864_s23 }
  0xe2   :  { %119 = vrot.lane.b32.xlu2 %v1912_v19, %s1865_s24  ;;  %117 = vrot.lane.b32.xlu1 %v1904_v18, %s1865_s24 }
  0xe3   :  { %113 = vrot.lane.b32.xlu0 %v1912_v19, %s1863_s22 }
  0xea   :  { %129 = vrot.lane.b32.xlu2 %v1904_v18, %s1866_s25  ;;  %125 = vrot.lane.b32.xlu1 %v1912_v19, %s1867_s26 }
  0xeb   :  { %123 = vrot.lane.b32.xlu0 %v1904_v18, %s1867_s26 }
  0xf2   :  { %137 = vrot.lane.b32.xlu2 %v1912_v19, %s1868_s27  ;;  %135 = vrot.lane.b32.xlu1 %v1904_v18, %s1868_s27 }
  0xf3   :  { %131 = vrot.lane.b32.xlu0 %v1912_v19, %s1866_s25 }
  0xfa   :  { %147 = vrot.lane.b32.xlu2 %v1904_v18, %s1869_s28  ;;  %143 = vrot.lane.b32.xlu1 %v1912_v19, %s1870_s29 }
  0xfb   :  { %141 = vrot.lane.b32.xlu0 %v1904_v18, %s1870_s29 }
 0x102   :  { %155 = vrot.lane.b32.xlu2 %v1912_v19, %s1871_s30  ;;  %153 = vrot.lane.b32.xlu1 %v1904_v18, %s1871_s30 }
 0x103   :  { %149 = vrot.lane.b32.xlu0 %v1912_v19, %s1869_s28 }
 0x10a   :  { %165 = vrot.lane.b32.xlu2 %v1904_v18, %s1872_s3  ;;  %161 = vrot.lane.b32.xlu1 %v1912_v19, %s1873_s4 }
 0x10b   :  { %159 = vrot.lane.b32.xlu0 %v1904_v18, %s1873_s4 }
 0x112   :  { %173 = vrot.lane.b32.xlu2 %v1912_v19, %s1858_s18  ;;  %171 = vrot.lane.b32.xlu1 %v1904_v18, %s1858_s18 }
 0x113   :  { %167 = vrot.lane.b32.xlu0 %v1912_v19, %s1872_s3 }
 0x124   :  { %v100_v20 = vpop.permute.xlu2 %99 }
 0x125   :  { %v190_v55 = vrot.slane %v100_v20, 4 }
 0x12c   :  { %v102_v21 = vpop.permute.xlu2 %101 }
 0x12d   :  { %v414_v27 = vrot.slane %v102_v21, 4 }
 0x134   :  { %v1968_v24 = vpop.permute.xlu2 %111 }
 0x13c   :  { %v94_v22 = vpop.permute.xlu1 %93  ;;  %v120_v36 = vpop.permute.xlu2 %119 }
 0x13d   :  { %v88_v23 = vpop.permute.xlu0 %87  ;;  %v426_v44 = vrot.slane %v120_v36, 4  ;;  %v181_v53 = vsel %vm178_vm0, %v94_v22, %v180_v47  ;;  %v177_v57 = vrot.slane %v94_v22, 4 }
 0x13e   :  { %v192_v54 = vrot.slane %v88_v23, 4  ;;  %v1995_v58 = vperm.slane %v181_v53, %v1970_v29  ;;  %v191_v59 = vsel %vm178_vm0, %v190_v55, %v88_v23 }
 0x13f   :  { %v2000_v0 = vperm.slane %v191_v59, %v1970_v29  ;;  %v179_v3 = vsel %vm178_vm0, %v177_v57, %v1904_v18 }
 0x140   :  { %v193_v60 = vsel %vm178_vm0, %v100_v20, %v192_v54  ;;  %v240_v4 = vrot.slane %v1995_v58, 4  ;;  %v2014_v11 = vperm.slane %v179_v3, %v1970_v29 }
 0x141   :  { %v2008_v5 = vperm.slane %v193_v60, %v1970_v29  ;;  %v226_v12 = vrot.slane %v2000_v0, 4 }
 0x143   :  { %v241_v16 = vsel %vm178_vm0, %v2008_v5, %v240_v4  ;;  %v227_v26 = vsel %vm178_vm0, %v226_v12, %v2014_v11  ;;  %v228_v12 = vrot.slane %v2014_v11, 4 }
 0x144   :  { %v96_v28 = vpop.permute.xlu1 %95  ;;  %v2002_v1 = vpop.permute.xlu2 %129  ;;  %v2029_v25 = vperm.slane %v241_v16, %v2011_v10  ;;  %v233_v59 = vperm.slane %v227_v26, %v2011_v10 }
 0x145   :  { %v402_v30 = vrot.slane %v96_v28, 4  ;;  %v90_v31 = vpop.permute.xlu0 %89  ;;  %v405_v42 = vsel %vm178_vm0, %v96_v28, %v404_v37 }
 0x146   :  { %v415_v32 = vsel %vm178_vm0, %v414_v27, %v90_v31  ;;  %v416_v33 = vrot.slane %v90_v31, 4  ;;  %v413_v50 = vperm.slane %v405_v42, %v1970_v29  ;;  %v288_v53 = vrot.slane %v2029_v25, 4 }
 0x147   :  { %v403_v34 = vsel %vm178_vm0, %v402_v30, %v1912_v19  ;;  %v421_v35 = vperm.slane %v415_v32, %v1970_v29  ;;  %v216_v19 = vrot.slane %v1968_v24, 4 }
 0x148   :  { %v409_v38 = vperm.slane %v403_v34, %v1970_v29  ;;  %v417_v39 = vsel %vm178_vm0, %v102_v21, %v416_v33  ;;  %v464_v7 = vrot.slane %v413_v50, 4 }
 0x149   :  { %v425_v40 = vperm.slane %v417_v39, %v1970_v29  ;;  %v450_v41 = vrot.slane %v421_v35, 4 }
 0x14a   :  { %v452_v43 = vrot.slane %v409_v38, 4 }
 0x14b   :  { %v462_v45 = vrot.slane %v425_v40, 4  ;;  %v1982_v46 = vsel %vm178_vm0, %v450_v41, %v409_v38  ;;  %v465_v18 = vsel %vm178_vm0, %v425_v40, %v464_v7 }
 0x14c   :  { %v1986_v48 = vsel %vm178_vm0, %v421_v35, %v452_v43  ;;  %v108_v49 = vpop.permute.xlu1 %107  ;;  %v2035_v32 = vperm.slane %v465_v18, %v2011_v10  ;;  %v2037_v33 = vpop.permute.xlu2 %137 }
 0x14d   :  { %v427_v51 = vsel %vm178_vm0, %v426_v44, %v108_v49  ;;  %v106_v52 = vpop.permute.xlu0 %105  ;;  %v1992_v56 = vsel %vm178_vm0, %v462_v45, %v413_v50  ;;  %v428_v61 = vrot.slane %v108_v49, 4  ;;  %v461_v18 = vperm.slane %v1986_v48, %v2011_v10 }
 0x14e   :  { %v204_v8 = vrot.slane %v106_v52, 4  ;;  %v433_v15 = vperm.slane %v427_v51, %v1970_v29  ;;  %v512_v50 = vrot.slane %v2035_v32, 4 }
 0x14f   :  { %v429_v9 = vsel %vm178_vm0, %v120_v36, %v428_v61 }
 0x150   :  { %v437_v17 = vperm.slane %v429_v9, %v1970_v29  ;;  %v476_v27 = vrot.slane %v433_v15, 4  ;;  %v276_v9 = vrot.slane %v233_v59, 4 }
 0x152   :  { %v488_v34 = vrot.slane %v437_v17, 4 }
 0x154   :  { %v118_v2 = vpop.permute.xlu1 %117 }
 0x155   :  { %v114_v6 = vpop.permute.xlu0 %113  ;;  %v202_v13 = vrot.slane %v118_v2, 4  ;;  %v205_v14 = vsel %vm178_vm0, %v118_v2, %v204_v8 }
 0x156   :  { %v2025_v20 = vperm.slane %v205_v14, %v1970_v29  ;;  %v440_v21 = vrot.slane %v114_v6, 4 }
 0x157   :  { %v203_v22 = vsel %vm178_vm0, %v202_v13, %v106_v52  ;;  %v2082_v13 = vpop.permute.xlu2 %147 }
 0x158   :  { %v209_v38 = vperm.slane %v203_v22, %v1970_v29  ;;  %v264_v39 = vrot.slane %v2025_v20, 4 }
 0x15a   :  { %v252_v60 = vrot.slane %v209_v38, 4 }
 0x15c   :  { %v126_v23 = vpop.permute.xlu1 %125 }
 0x15d   :  { %v438_v28 = vrot.slane %v126_v23, 4  ;;  %v441_v30 = vsel %vm178_vm0, %v126_v23, %v440_v21  ;;  %v124_v31 = vpop.permute.xlu0 %123 }
 0x15e   :  { %v449_v35 = vperm.slane %v441_v30, %v1970_v29  ;;  %v214_v36 = vrot.slane %v124_v31, 4  ;;  %v217_v37 = vsel %vm178_vm0, %v124_v31, %v216_v19  ;;  %v229_v30 = vsel %vm178_vm0, %v2000_v0, %v228_v12 }
 0x15f   :  { %v439_v40 = vsel %vm178_vm0, %v438_v28, %v114_v6  ;;  %v2045_v41 = vperm.slane %v217_v37, %v1970_v29 }
 0x160   :  { %v445_v42 = vperm.slane %v439_v40, %v1970_v29  ;;  %v486_v43 = vrot.slane %v449_v35, 4  ;;  %v215_v44 = vsel %vm178_vm0, %v214_v36, %v1968_v24  ;;  %v489_v45 = vsel %vm178_vm0, %v449_v35, %v488_v34 }
 0x161   :  { %v221_v47 = vperm.slane %v215_v44, %v1970_v29  ;;  %v2053_v49 = vperm.slane %v489_v45, %v2011_v10  ;;  %v265_v51 = vsel %vm178_vm0, %v2045_v41, %v264_v39  ;;  %v457_v35 = vperm.slane %v1982_v46, %v2011_v10 }
 0x162   :  { %v273_v52 = vperm.slane %v265_v51, %v2011_v10  ;;  %v477_v54 = vsel %vm178_vm0, %v445_v42, %v476_v27  ;;  %v487_v24 = vsel %vm178_vm0, %v486_v43, %v437_v17  ;;  %v474_v4 = vrot.slane %v445_v42, 4  ;;  %v2131_v43 = vpop.permute.xlu2 %155 }
 0x163   :  { %v250_v55 = vrot.slane %v221_v47, 4  ;;  %v2064_v57 = vsel %vm178_vm0, %v2053_v49, %v512_v50  ;;  %v253_v7 = vsel %vm178_vm0, %v221_v47, %v252_v60  ;;  %v485_v26 = vperm.slane %v477_v54, %v2011_v10 }
 0x164   :  { %v2067_v61 = vpop.permute.xlu1 %135  ;;  %v717_v62 = vsel %vm626_vm1, %v2064_v57, -inf  ;;  %v2072_v63 = vsel %vm178_vm0, %v273_v52, %v288_v53  ;;  %v2088_v17 = vperm.slane %v253_v7, %v2011_v10  ;;  %v475_v21 = vsel %vm178_vm0, %v474_v4, %v433_v15 }
 0x165   :  { %v2074_v2 = vpop.permute.xlu0 %131  ;;  %718 = vmax.xlane.f32.xlu2 %v717_v62  ;;  %v669_v3 = vsel %vm626_vm1, %v2072_v63, -inf  ;;  %v251_v6 = vsel %vm178_vm0, %v250_v55, %v209_v38  ;;  %v481_v11 = vperm.slane %v475_v21, %v2011_v10  ;;  %v286_v23 = vrot.slane %v273_v52, 4 }
 0x166   :  { %670 = vmax.xlane.f32.xlu1 %v669_v3  ;;  %v257_v8 = vperm.slane %v251_v6, %v2011_v10  ;;  %v516_v19 = vrot.slane %v2074_v2, 4  ;;  %v278_v34 = vrot.slane %v2088_v17, 4  ;;  %v504_v36 = vrot.slane %v461_v18, 4 }
 0x167   :  { %v498_v37 = vrot.slane %v481_v11, 4  ;;  %v2115_v38 = vperm.slane %v229_v30, %v2011_v10  ;;  %v2119_v0 = vsel %vm178_vm0, %v286_v23, %v2029_v25  ;;  %v500_v46 = vrot.slane %v457_v35, 4 }
 0x168   :  { %v274_v14 = vrot.slane %v257_v8, 4  ;;  %v2085_v16 = vsel %vm178_vm0, %v257_v8, %v276_v9  ;;  %v2122_v39 = vsel %vm178_vm0, %v485_v26, %v504_v36  ;;  %v528_v25 = vrot.slane %v2037_v33, 4 }
 0x169   :  { %v633_v48 = vsel %vm626_vm1, %v2085_v16, -inf  ;;  %v2125_v40 = vsel %vm178_vm0, %v498_v37, %v457_v35  ;;  %v2129_v42 = vsel %vm178_vm0, %v278_v34, %v2115_v38  ;;  %v2135_v45 = vsel %vm178_vm0, %v481_v11, %v500_v46 }
 0x16a   :  { %v2095_v22 = vsel %vm178_vm0, %v274_v14, %v233_v59  ;;  %v639_v47 = vsel %vm626_vm1, %v2129_v42, -inf  ;;  %v502_v53 = vrot.slane %v485_v26, 4  ;;  %v510_v55 = vrot.slane %v2053_v49, 4  ;;  %v166_v14 = vpop.permute.xlu2 %165 }
 0x16b   :  { %v627_v27 = vsel %vm626_vm1, %v2095_v22, -inf  ;;  %v469_v59 = vperm.slane %v1992_v56, %v2011_v10  ;;  %v493_v60 = vperm.slane %v487_v24, %v2011_v10  ;;  %v302_v24 = vrot.slane %v2082_v13, 4 }
 0x16c   :  { %v2101_v28 = vpop.permute.xlu1 %143  ;;  %628 = vmax.xlane.f32.xlu0 %v627_v27  ;;  %v2156_v8 = vsel %vm178_vm0, %v502_v53, %v461_v18  ;;  %v2160_v49 = vsel %vm178_vm0, %v510_v55, %v2035_v32  ;;  %v314_v23 = vrot.slane %v166_v14, 4  ;;  %v238_v46 = vrot.slane %v2008_v5, 4 }
 0x16d   :  { %v517_v15 = vsel %vm178_vm0, %v2101_v28, %v516_v19  ;;  %v2109_v31 = vpop.permute.xlu0 %141  ;;  %634 = vmax.xlane.f32.xlu2 %v633_v48  ;;  %v506_v56 = vrot.slane %v493_v60, 4  ;;  %v508_v9 = vrot.slane %v469_v59, 4  ;;  %v303_v32 = vsel %vm178_vm0, %v302_v24, %v2067_v61 }
 0x16e   :  { %v525_v44 = vperm.slane %v517_v15, %v1970_v29  ;;  %v290_v51 = vrot.slane %v2109_v31, 4  ;;  %v309_v26 = vperm.slane %v303_v32, %v1970_v29  ;;  %v262_v55 = vrot.slane %v2045_v41, 4 }
 0x16f   :  { %v2170_v11 = vsel %vm178_vm0, %v506_v56, %v469_v59  ;;  %v2173_v18 = vsel %vm178_vm0, %v493_v60, %v508_v9  ;;  %v304_v24 = vrot.slane %v2067_v61, 4 }
 0x170   :  { %v576_v62 = vrot.slane %v525_v44, 4  ;;  %v291_v4 = vsel %vm178_vm0, %v290_v51, %v2002_v1  ;;  %v338_v34 = vrot.slane %v309_v26, 4 }
 0x171   :  { %v297_v19 = vperm.slane %v291_v4, %v1970_v29 }
 0x173   :  { %v340_v27 = vrot.slane %v297_v19, 4 }
 0x174   :  { %v154_v50 = vpop.permute.xlu1 %153  ;;  %640 = vmax.xlane.f32.xlu0 %v639_v47  ;;  %v339_v47 = vsel %vm178_vm0, %v338_v34, %v297_v19 }
 0x175   :  { %v2141_v52 = vpop.permute.xlu0 %149  ;;  %v315_v48 = vsel %vm178_vm0, %v314_v23, %v154_v50  ;;  %v316_v15 = vrot.slane %v154_v50, 4  ;;  %v341_v37 = vsel %vm178_vm0, %v309_v26, %v340_v27  ;;  %v345_v5 = vperm.slane %v339_v47, %v2011_v10 }
 0x176   :  { %v529_v54 = vsel %vm178_vm0, %v2141_v52, %v528_v25  ;;  %v321_v35 = vperm.slane %v315_v48, %v1970_v29  ;;  %v349_v50 = vperm.slane %v341_v37, %v2011_v10 }
 0x177   :  { %v537_v3 = vperm.slane %v529_v54, %v1970_v29  ;;  %v317_v51 = vsel %vm178_vm0, %v166_v14, %v316_v15  ;;  %v388_v26 = vrot.slane %v345_v5, 4  ;;  %v305_v15 = vsel %vm178_vm0, %v2082_v13, %v304_v24 }
 0x178   :  { %v364_v59 = vrot.slane %v321_v35, 4  ;;  %v325_v4 = vperm.slane %v317_v51, %v1970_v29  ;;  %v313_v13 = vperm.slane %v305_v15, %v1970_v29 }
 0x179   :  { %v574_v6 = vrot.slane %v537_v3, 4  ;;  %v2153_v7 = vsel %vm178_vm0, %v537_v3, %v576_v62  ;;  %v292_v62 = vrot.slane %v2002_v1, 4  ;;  %v239_v3 = vsel %vm178_vm0, %v238_v46, %v1995_v58 }
 0x17a   :  { %v392_v1 = vrot.slane %v349_v50, 4  ;;  %v263_v58 = vsel %vm178_vm0, %v262_v55, %v2025_v20  ;;  %v245_v27 = vperm.slane %v239_v3, %v2011_v10  ;;  %v376_v48 = vrot.slane %v325_v4, 4 }
 0x17b   :  { %v2164_v12 = vsel %vm178_vm0, %v574_v6, %v525_v44  ;;  %v293_v41 = vsel %vm178_vm0, %v2109_v31, %v292_v62  ;;  %v174_v62 = vpop.permute.xlu2 %173  ;;  %v350_v3 = vrot.slane %v313_v13, 4 }
 0x17c   :  { %v2167_v21 = vpop.permute.xlu1 %161  ;;  %v301_v61 = vperm.slane %v293_v41, %v1970_v29 }
 0x17d   :  { %v160_v30 = vpop.permute.xlu0 %159 }
 0x17e   :  { %v328_v44 = vrot.slane %v160_v30, 4  ;;  %v352_v47 = vrot.slane %v301_v61, 4 }
 0x184   :  { %v172_v36 = vpop.permute.xlu1 %171 }
 0x185   :  { %v326_v25 = vrot.slane %v172_v36, 4  ;;  %v329_v54 = vsel %vm178_vm0, %v172_v36, %v328_v44  ;;  %v284_v44 = vrot.slane %v245_v27, 4 }
 0x186   :  { %v337_v6 = vperm.slane %v329_v54, %v1970_v29  ;;  %v526_v54 = vrot.slane %v2141_v52, 4 }
 0x187   :  { %v327_v53 = vsel %vm178_vm0, %v326_v25, %v160_v30  ;;  %v280_v25 = vrot.slane %v2115_v38, 4 }
 0x188   :  { %v333_v60 = vperm.slane %v327_v53, %v1970_v29  ;;  %v374_v31 = vrot.slane %v337_v6, 4  ;;  %v377_v36 = vsel %vm178_vm0, %v337_v6, %v376_v48  ;;  %v168_v6 = vpop.permute.xlu0 %167 }
 0x189   :  { %v2237_v38 = vsel %vm178_vm0, %v2088_v17, %v280_v25  ;;  %v550_v17 = vrot.slane %v174_v62, 4 }
 0x18a   :  { %v362_v56 = vrot.slane %v333_v60, 4  ;;  %v365_v9 = vsel %vm178_vm0, %v333_v60, %v364_v59  ;;  %v375_v53 = vsel %vm178_vm0, %v374_v31, %v325_v4  ;;  %v2233_v60 = vperm.slane %v377_v36, %v2011_v10 }
 0x18b   :  { %v373_v14 = vperm.slane %v365_v9, %v2011_v10  ;;  %v353_v4 = vsel %vm178_vm0, %v313_v13, %v352_v47  ;;  %v645_v41 = vsel %vm626_vm1, %v2237_v38, -inf }
 0x18c   :  { %v363_v19 = vsel %vm178_vm0, %v362_v56, %v321_v35  ;;  %v269_v35 = vperm.slane %v263_v58, %v2011_v10  ;;  %v527_v56 = vsel %vm178_vm0, %v526_v54, %v2037_v33  ;;  %v398_v24 = vrot.slane %v2233_v60, 4 }
 0x18d   :  { %v2204_v32 = vsel %vm178_vm0, %v373_v14, %v392_v1  ;;  %v369_v23 = vperm.slane %v363_v19, %v2011_v10  ;;  %v390_v59 = vrot.slane %v373_v14, 4  ;;  %v351_v14 = vsel %vm178_vm0, %v350_v3, %v301_v61 }
 0x18e   :  { %v648_v30 = vsel %vm626_vm1, %v2204_v32, -inf  ;;  %v2230_v55 = vsel %vm178_vm0, %v269_v35, %v284_v44  ;;  %v514_v1 = vrot.slane %v2101_v28, 4  ;;  %v538_v19 = vrot.slane %v168_v6, 4 }
 0x18f   :  { %649 = vmax.xlane.f32.xlu0 %v648_v30  ;;  %v2214_v20 = vsel %vm178_vm0, %v369_v23, %v388_v26  ;;  %v386_v34 = vrot.slane %v369_v23, 4  ;;  %v657_v52 = vsel %vm626_vm1, %v2230_v55, -inf  ;;  %v2246_v9 = vsel %vm178_vm0, %v390_v59, %v349_v50 }
 0x190   :  { %v636_v37 = vsel %vm626_vm1, %v2214_v20, -inf  ;;  %v361_v58 = vperm.slane %v353_v4, %v2011_v10  ;;  %v533_v33 = vperm.slane %v527_v56, %v1970_v29  ;;  %v642_v50 = vsel %vm626_vm1, %v2246_v9, -inf }
 0x191   :  { %637 = vmax.xlane.f32.xlu2 %v636_v37  ;;  %v2221_v46 = vsel %vm178_vm0, %v386_v34, %v345_v5  ;;  %v381_v5 = vperm.slane %v375_v53, %v2011_v10  ;;  %v551_v26 = vsel %vm178_vm0, %v550_v17, %v2167_v21  ;;  %v357_v61 = vperm.slane %v351_v14, %v2011_v10 }
 0x192   :  { %v630_v51 = vsel %vm626_vm1, %v2221_v46, -inf  ;;  %v2260_v48 = vsel %vm178_vm0, %v398_v24, %v361_v58  ;;  %v282_v28 = vrot.slane %v269_v35, 4  ;;  %v515_v31 = vsel %vm178_vm0, %v514_v1, %v2074_v2 }
 0x193   :  { %631 = vmax.xlane.f32.xlu1 %v630_v51  ;;  %v394_v23 = vrot.slane %v381_v5, 4  ;;  %v539_v30 = vsel %vm178_vm0, %v538_v19, %v2131_v43  ;;  %v562_v34 = vrot.slane %v533_v33, 4  ;;  %v557_v36 = vperm.slane %v551_v26, %v1970_v29 }
 0x194   :  { %v666_v37 = vsel %vm626_vm1, %v2260_v48, -inf  ;;  %v2274_v44 = vsel %vm178_vm0, %v282_v28, %v245_v27  ;;  %v521_v35 = vperm.slane %v515_v31, %v1970_v29  ;;  %v545_v2 = vperm.slane %v539_v30, %v1970_v29 }
 0x195   :  { %v2268_v15 = vsel %vm178_vm0, %v394_v23, %v357_v61  ;;  %v586_v13 = vrot.slane %v557_v36, 4  ;;  %v651_v47 = vsel %vm626_vm1, %v2274_v44, -inf  ;;  %v552_v53 = vrot.slane %v2167_v21, 4 }
 0x196   :  { %v654_v25 = vsel %vm626_vm1, %v2268_v15, -inf  ;;  %v563_v51 = vsel %vm178_vm0, %v562_v34, %v521_v35  ;;  %v396_v54 = vrot.slane %v357_v61, 4  ;;  %v675_v3 = vsel %vm626_vm1, %v2125_v40, -inf }
 0x197   :  { %658 = vmax.xlane.f32.xlu0 %v657_v52  ;;  %v587_v27 = vsel %vm178_vm0, %v586_v13, %v545_v2  ;;  %v569_v59 = vperm.slane %v563_v51, %v2011_v10  ;;  %v540_v52 = vrot.slane %v2131_v43, 4  ;;  %v553_v4 = vsel %vm178_vm0, %v174_v62, %v552_v53 }
 0x198   :  { %v2291_v56 = vsel %vm178_vm0, %v381_v5, %v396_v54  ;;  %v593_v24 = vperm.slane %v587_v27, %v2011_v10  ;;  %v663_v21 = vsel %vm626_vm1, %v2119_v0, -inf  ;;  %v561_v14 = vperm.slane %v553_v4, %v1970_v29 }
 0x199   :  { %646 = vmax.xlane.f32.xlu2 %v645_v41  ;;  %v541_v17 = vsel %vm178_vm0, %v168_v6, %v540_v52  ;;  %v612_v41 = vrot.slane %v569_v59, 4  ;;  %v660_v43 = vsel %vm626_vm1, %v2291_v56, -inf  ;;  %v400_v5 = vrot.slane %v361_v58, 4 }
 0x19a   :  { %v610_v1 = vrot.slane %v593_v24, 4  ;;  %v549_v19 = vperm.slane %v541_v17, %v1970_v29  ;;  %v598_v6 = vrot.slane %v561_v14, 4  ;;  %v564_v34 = vrot.slane %v521_v35, 4 }
 0x19b   :  { %643 = vmax.xlane.f32.xlu1 %v642_v50  ;;  %v2301_v62 = vsel %vm178_vm0, %v593_v24, %v612_v41  ;;  %v2306_v23 = vsel %vm178_vm0, %v2233_v60, %v400_v5  ;;  %v588_v50 = vrot.slane %v545_v2, 4  ;;  %v693_v2 = vsel %vm626_vm1, %v2122_v39, -inf }
 0x19c   :  { %v684_v26 = vsel %vm626_vm1, %v2301_v62, -inf  ;;  %v2311_v61 = vsel %vm178_vm0, %v610_v1, %v569_v59  ;;  %v599_v28 = vsel %vm178_vm0, %v598_v6, %v549_v19  ;;  %v672_v58 = vsel %vm626_vm1, %v2306_v23, -inf }
 0x19d   :  { %v678_v31 = vsel %vm626_vm1, %v2311_v61, -inf  ;;  %v589_v60 = vsel %vm178_vm0, %v557_v36, %v588_v50  ;;  %v605_v30 = vperm.slane %v599_v28, %v2011_v10  ;;  %v581_v36 = vperm.slane %v2164_v12, %v2011_v10 }
 0x19e   :  { %v687_v35 = vsel %vm626_vm1, %v2156_v8, -inf  ;;  %v711_v17 = vsel %vm626_vm1, %v2160_v49, -inf  ;;  %v705_v1 = vsel %vm626_vm1, %v2173_v18, -inf }
 0x19f   :  { %667 = vmax.xlane.f32.xlu0 %v666_v37  ;;  %v597_v37 = vperm.slane %v589_v60, %v2011_v10  ;;  %v618_v13 = vrot.slane %v605_v30, 4 }
 0x1a1   :  { %655 = vmax.xlane.f32.xlu2 %v654_v25  ;;  %v565_v25 = vsel %vm178_vm0, %v533_v33, %v564_v34  ;;  %v614_v53 = vrot.slane %v597_v37, 4  ;;  %v2332_v27 = vsel %vm178_vm0, %v618_v13, %v581_v36 }
 0x1a2   :  { %v573_v51 = vperm.slane %v565_v25, %v2011_v10  ;;  %v702_v59 = vsel %vm626_vm1, %v2332_v27, -inf }
 0x1a3   :  { %652 = vmax.xlane.f32.xlu1 %v651_v47  ;;  %v681_v47 = vsel %vm626_vm1, %v2135_v45, -inf }
 0x1a4   :  { %v2335_v33 = vsel %vm178_vm0, %v614_v53, %v573_v51  ;;  %v616_v54 = vrot.slane %v573_v51, 4 }
 0x1a5   :  { %v690_v52 = vsel %vm626_vm1, %v2335_v33, -inf }
 0x1a6   :  { %v2340_v12 = vsel %vm178_vm0, %v597_v37, %v616_v54 }
 0x1a7   :  { %676 = vmax.xlane.f32.xlu0 %v675_v3  ;;  %v600_v3 = vrot.slane %v549_v19, 4  ;;  %v696_v4 = vsel %vm626_vm1, %v2340_v12, -inf  ;;  %v620_v19 = vrot.slane %v581_v36, 4 }
 0x1a9   :  { %664 = vmax.xlane.f32.xlu2 %v663_v21  ;;  %v601_v24 = vsel %vm178_vm0, %v561_v14, %v600_v3  ;;  %v585_v21 = vperm.slane %v2153_v7, %v2011_v10  ;;  %v2360_v6 = vsel %vm178_vm0, %v605_v30, %v620_v19 }
 0x1aa   :  { %v609_v41 = vperm.slane %v601_v24, %v2011_v10  ;;  %v708_v28 = vsel %vm626_vm1, %v2360_v6, -inf }
 0x1ab   :  { %661 = vmax.xlane.f32.xlu1 %v660_v43  ;;  %v699_v43 = vsel %vm626_vm1, %v2170_v11, -inf  ;;  %v624_v5 = vrot.slane %v585_v21, 4 }
 0x1ac   :  { %v622_v7 = vrot.slane %v609_v41, 4 }
 0x1ad   :  { %v2357_v14 = vsel %vm178_vm0, %v609_v41, %v624_v5 }
 0x1ae   :  { %v720_v50 = vsel %vm626_vm1, %v2357_v14, -inf }
 0x1af   :  { %685 = vmax.xlane.f32.xlu0 %v684_v26  ;;  %v2365_v26 = vsel %vm178_vm0, %v622_v7, %v585_v21 }
 0x1b1   :  { %673 = vmax.xlane.f32.xlu2 %v672_v58  ;;  %v714_v58 = vsel %vm626_vm1, %v2365_v26, -inf }
 0x1b3   :  { %679 = vmax.xlane.f32.xlu1 %v678_v31 }
 0x1b7   :  { %694 = vmax.xlane.f32.xlu0 %v693_v2 }
 0x1b9   :  { %682 = vmax.xlane.f32.xlu2 %v681_v47 }
 0x1bb   :  { %688 = vmax.xlane.f32.xlu1 %v687_v35 }
 0x1bf   :  { %703 = vmax.xlane.f32.xlu0 %v702_v59 }
 0x1c1   :  { %691 = vmax.xlane.f32.xlu2 %v690_v52 }
 0x1c3   :  { %697 = vmax.xlane.f32.xlu1 %v696_v4 }
 0x1c7   :  { %712 = vmax.xlane.f32.xlu0 %v711_v17 }
 0x1c9   :  { %700 = vmax.xlane.f32.xlu2 %v699_v43 }
 0x1cb   :  { %706 = vmax.xlane.f32.xlu1 %v705_v1 }
 0x1cf   :  { %721 = vmax.xlane.f32.xlu0 %v720_v50 }
 0x1d1   :  { %709 = vmax.xlane.f32.xlu2 %v708_v28 }
 0x1d3   :  { %715 = vmax.xlane.f32.xlu1 %v714_v58 }
 0x1d8   :  { %v719_v31 = vpop.xlane.xlu2 %718 }
 0x1d9   :  { %v671_v60 = vpop.xlane.xlu1 %670  ;;  %v753_v34 = vsub.f32 %v2064_v57, %v719_v31 }
 0x1da   :  { %v737_v30 = vsub.f32 %v2072_v63, %v671_v60 }
 0x1db   :  { %v815_v2 = vmul.f32 1.442695, %v753_v34 }
 0x1dc   :  { %v783_v37 = vmul.f32 1.442695, %v737_v30 }
 0x1de   :  { %1650 = vpow2.f32 %v783_v37 }
 0x1df   :  { %v629_v25 = vpop.xlane.xlu0 %628  ;;  %1652 = vpow2.f32 %v815_v2 }
 0x1e0   :  { %v723_v13 = vsub.f32 %v2095_v22, %v629_v25  ;;  %v635_v47 = vpop.xlane.xlu2 %634 }
 0x1e1   :  { %v725_v53 = vsub.f32 %v2085_v16, %v635_v47 }
 0x1e2   :  { %v755_v36 = vmul.f32 1.442695, %v723_v13 }
 0x1e3   :  { %v759_v63 = vmul.f32 1.442695, %v725_v53 }
 0x1e4   :  { %v2374_v51 = vpop.eup %1650  ;;  %1654 = vpow2.f32 %v755_v36 }
 0x1e5   :  { %v861_v35 = vsel %vm626_vm1, %v2374_v51, 0.0  ;;  %v2379_v57 = vpop.eup %1652  ;;  %1656 = vpow2.f32 %v759_v63 }
 0x1e6   :  { %862 = vadd.xlane.f32.xlu0 %v861_v35  ;;  %v909_v59 = vsel %vm626_vm1, %v2379_v57, 0.0 }
 0x1e7   :  { %v641_v52 = vpop.xlane.xlu0 %640 }
 0x1e8   :  { %v727_v5 = vsub.f32 %v2129_v42, %v641_v52 }
 0x1ea   :  { %v2381_v54 = vpop.eup %1654  ;;  %v763_v7 = vmul.f32 1.442695, %v727_v5 }
 0x1eb   :  { %v819_v22 = vsel %vm626_vm1, %v2381_v54, 0.0  ;;  %v2387_v16 = vpop.eup %1656 }
 0x1ec   :  { %820 = vadd.xlane.f32.xlu1 %v819_v22  ;;  %v825_v3 = vsel %vm626_vm1, %v2387_v16, 0.0 }
 0x1ee   :  { %910 = vadd.xlane.f32.xlu0 %v909_v59 }
 0x1f6   :  { %826 = vadd.xlane.f32.xlu0 %v825_v3 }
 0x202   :  { %v650_v4 = vpop.xlane.xlu0 %649 }
 0x203   :  { %v730_v30 = vsub.f32 %v2204_v32, %v650_v4 }
 0x204   :  { %v638_v24 = vpop.xlane.xlu2 %637 }
 0x205   :  { %v726_v21 = vsub.f32 %v2214_v20, %v638_v24  ;;  %v769_v2 = vmul.f32 1.442695, %v730_v30 }
 0x206   :  { %v632_v17 = vpop.xlane.xlu1 %631 }
 0x207   :  { %v761_v41 = vmul.f32 1.442695, %v726_v21  ;;  %v724_v43 = vsub.f32 %v2221_v46, %v632_v17 }
 0x209   :  { %1658 = vpow2.f32 %v761_v41  ;;  %v757_v1 = vmul.f32 1.442695, %v724_v43 }
 0x20a   :  { %v659_v19 = vpop.xlane.xlu0 %658 }
 0x20b   :  { %1660 = vpow2.f32 %v757_v1  ;;  %v733_v35 = vsub.f32 %v2230_v55, %v659_v19 }
 0x20c   :  { %v647_v50 = vpop.xlane.xlu2 %646  ;;  %1662 = vpow2.f32 %v763_v7 }
 0x20d   :  { %v729_v28 = vsub.f32 %v2237_v38, %v647_v50 }
 0x20e   :  { %v644_v58 = vpop.xlane.xlu1 %643 }
 0x20f   :  { %v2395_v31 = vpop.eup %1658  ;;  %v767_v60 = vmul.f32 1.442695, %v729_v28  ;;  %v728_v20 = vsub.f32 %v2246_v9, %v644_v58 }
 0x210   :  { %v828_v42 = vsel %vm626_vm1, %v2395_v31, 0.0 }
 0x211   :  { %v2401_v46 = vpop.eup %1660  ;;  %1664 = vpow2.f32 %v767_v60  ;;  %v765_v34 = vmul.f32 1.442695, %v728_v20  ;;  %829 = vadd.xlane.f32.xlu1 %v828_v42 }
 0x212   :  { %v668_v37 = vpop.xlane.xlu0 %667  ;;  %v822_v38 = vsel %vm626_vm1, %v2401_v46, 0.0  ;;  %v2406_v13 = vpop.eup %1662 }
 0x213   :  { %1666 = vpow2.f32 %v765_v34  ;;  %823 = vadd.xlane.f32.xlu2 %v822_v38  ;;  %v831_v3 = vsel %vm626_vm1, %v2406_v13, 0.0  ;;  %v736_v5 = vsub.f32 %v2260_v48, %v668_v37 }
 0x214   :  { %v656_v25 = vpop.xlane.xlu2 %655  ;;  %1668 = vpow2.f32 %v769_v2 }
 0x215   :  { %v732_v9 = vsub.f32 %v2268_v15, %v656_v25 }
 0x216   :  { %v653_v32 = vpop.xlane.xlu1 %652 }
 0x217   :  { %v2408_v47 = vpop.eup %1664  ;;  %v773_v36 = vmul.f32 1.442695, %v732_v9  ;;  %v731_v53 = vsub.f32 %v2274_v44, %v653_v32  ;;  %v775_v44 = vmul.f32 1.442695, %v733_v35 }
 0x218   :  { %v837_v63 = vsel %vm626_vm1, %v2408_v47, 0.0 }
 0x219   :  { %v2414_v22 = vpop.eup %1666  ;;  %1670 = vpow2.f32 %v773_v36  ;;  %v771_v59 = vmul.f32 1.442695, %v731_v53  ;;  %838 = vadd.xlane.f32.xlu1 %v837_v63 }
 0x21a   :  { %v677_v15 = vpop.xlane.xlu0 %676  ;;  %v834_v52 = vsel %vm626_vm1, %v2414_v22, 0.0  ;;  %v2421_v24 = vpop.eup %1668 }
 0x21b   :  { %1672 = vpow2.f32 %v771_v59  ;;  %832 = vadd.xlane.f32.xlu2 %v831_v3  ;;  %835 = vadd.xlane.f32.xlu0 %v834_v52  ;;  %v840_v50 = vsel %vm626_vm1, %v2421_v24, 0.0  ;;  %v739_v37 = vsub.f32 %v2125_v40, %v677_v15 }
 0x21c   :  { %v665_v55 = vpop.xlane.xlu2 %664  ;;  %1674 = vpow2.f32 %v775_v44 }
 0x21d   :  { %v735_v4 = vsub.f32 %v2119_v0, %v665_v55 }
 0x21e   :  { %v662_v21 = vpop.xlane.xlu1 %661 }
 0x21f   :  { %v2423_v17 = vpop.eup %1670  ;;  %v779_v41 = vmul.f32 1.442695, %v735_v4  ;;  %v734_v43 = vsub.f32 %v2291_v56, %v662_v21  ;;  %v781_v56 = vmul.f32 1.442695, %v736_v5 }
 0x220   :  { %v846_v1 = vsel %vm626_vm1, %v2423_v17, 0.0 }
 0x221   :  { %v2429_v19 = vpop.eup %1672  ;;  %1676 = vpow2.f32 %v779_v41  ;;  %v777_v7 = vmul.f32 1.442695, %v734_v43  ;;  %847 = vadd.xlane.f32.xlu1 %v846_v1 }
 0x222   :  { %v686_v0 = vpop.xlane.xlu0 %685  ;;  %v843_v28 = vsel %vm626_vm1, %v2429_v19, 0.0  ;;  %v2436_v60 = vpop.eup %1674 }
 0x223   :  { %1678 = vpow2.f32 %v777_v7  ;;  %841 = vadd.xlane.f32.xlu2 %v840_v50  ;;  %844 = vadd.xlane.f32.xlu0 %v843_v28  ;;  %v849_v9 = vsel %vm626_vm1, %v2436_v60, 0.0  ;;  %v742_v3 = vsub.f32 %v2301_v62, %v686_v0 }
 0x224   :  { %v674_v48 = vpop.xlane.xlu2 %673  ;;  %1680 = vpow2.f32 %v781_v56 }
 0x225   :  { %v738_v58 = vsub.f32 %v2306_v23, %v674_v48 }
 0x226   :  { %v680_v20 = vpop.xlane.xlu1 %679 }
 0x227   :  { %v2438_v30 = vpop.eup %1676  ;;  %v785_v42 = vmul.f32 1.442695, %v738_v58  ;;  %v740_v34 = vsub.f32 %v2311_v61, %v680_v20  ;;  %v787_v61 = vmul.f32 1.442695, %v739_v37 }
 0x228   :  { %v855_v38 = vsel %vm626_vm1, %v2438_v30, 0.0 }
 0x229   :  { %v2444_v2 = vpop.eup %1678  ;;  %1682 = vpow2.f32 %v785_v42  ;;  %v789_v25 = vmul.f32 1.442695, %v740_v34  ;;  %856 = vadd.xlane.f32.xlu1 %v855_v38 }
 0x22a   :  { %v695_v23 = vpop.xlane.xlu0 %694  ;;  %v852_v32 = vsel %vm626_vm1, %v2444_v2, 0.0  ;;  %v2451_v53 = vpop.eup %1680 }
 0x22b   :  { %1684 = vpow2.f32 %v789_v25  ;;  %850 = vadd.xlane.f32.xlu2 %v849_v9  ;;  %853 = vadd.xlane.f32.xlu0 %v852_v32  ;;  %v858_v4 = vsel %vm626_vm1, %v2451_v53, 0.0  ;;  %v745_v50 = vsub.f32 %v2122_v39, %v695_v23 }
 0x22c   :  { %v683_v40 = vpop.xlane.xlu2 %682  ;;  %1686 = vpow2.f32 %v787_v61 }
 0x22d   :  { %v741_v36 = vsub.f32 %v2135_v45, %v683_v40 }
 0x22e   :  { %v689_v35 = vpop.xlane.xlu1 %688 }
 0x22f   :  { %v2453_v63 = vpop.eup %1682  ;;  %v791_v59 = vmul.f32 1.442695, %v741_v36  ;;  %v743_v15 = vsub.f32 %v2156_v8, %v689_v35  ;;  %v793_v8 = vmul.f32 1.442695, %v742_v3 }
 0x230   :  { %v864_v52 = vsel %vm626_vm1, %v2453_v63, 0.0 }
 0x231   :  { %v2459_v44 = vpop.eup %1684  ;;  %1688 = vpow2.f32 %v791_v59  ;;  %v795_v55 = vmul.f32 1.442695, %v743_v15  ;;  %865 = vadd.xlane.f32.xlu1 %v864_v52 }
 0x232   :  { %v2461_v45 = vpop.xlane.xlu0 %703  ;;  %v870_v21 = vsel %vm626_vm1, %v2459_v44, 0.0  ;;  %v2468_v43 = vpop.eup %1686 }
 0x233   :  { %1690 = vpow2.f32 %v795_v55  ;;  %859 = vadd.xlane.f32.xlu2 %v858_v4  ;;  %871 = vadd.xlane.f32.xlu0 %v870_v21 }
 0x234   :  { %v692_v62 = vpop.xlane.xlu2 %691  ;;  %1692 = vpow2.f32 %v793_v8 }
 0x235   :  { %v744_v41 = vsub.f32 %v2335_v33, %v692_v62  ;;  %v867_v33 = vsel %vm626_vm1, %v2468_v43, 0.0 }
 0x236   :  { %v698_v5 = vpop.xlane.xlu1 %697 }
 0x237   :  { %v2470_v1 = vpop.eup %1688  ;;  %v797_v7 = vmul.f32 1.442695, %v744_v41  ;;  %v746_v0 = vsub.f32 %v2340_v12, %v698_v5  ;;  %v799_v12 = vmul.f32 1.442695, %v745_v50  ;;  %v748_v50 = vsub.f32 %v2332_v27, %v2461_v45 }
 0x238   :  { %v873_v28 = vsel %vm626_vm1, %v2470_v1, 0.0 }
 0x239   :  { %v2476_v56 = vpop.eup %1690  ;;  %1694 = vpow2.f32 %v797_v7  ;;  %v801_v48 = vmul.f32 1.442695, %v746_v0  ;;  %874 = vadd.xlane.f32.xlu1 %v873_v28 }
 0x23a   :  { %v879_v58 = vsel %vm626_vm1, %v2476_v56, 0.0  ;;  %v713_v20 = vpop.xlane.xlu0 %712  ;;  %v2483_v34 = vpop.eup %1692 }
 0x23b   :  { %1696 = vpow2.f32 %v801_v48  ;;  %868 = vadd.xlane.f32.xlu2 %v867_v33  ;;  %880 = vadd.xlane.f32.xlu0 %v879_v58  ;;  %v751_v9 = vsub.f32 %v2160_v49, %v713_v20  ;;  %v805_v33 = vmul.f32 1.442695, %v748_v50 }
 0x23c   :  { %v701_v39 = vpop.xlane.xlu2 %700  ;;  %1698 = vpow2.f32 %v799_v12 }
 0x23d   :  { %v747_v42 = vsub.f32 %v2170_v11, %v701_v39  ;;  %v876_v11 = vsel %vm626_vm1, %v2483_v34, 0.0 }
 0x23e   :  { %v707_v37 = vpop.xlane.xlu1 %706 }
 0x23f   :  { %v2485_v38 = vpop.eup %1694  ;;  %v803_v25 = vmul.f32 1.442695, %v747_v42  ;;  %v749_v23 = vsub.f32 %v2173_v18, %v707_v37  ;;  %v811_v18 = vmul.f32 1.442695, %v751_v9 }
 0x240   :  { %v882_v32 = vsel %vm626_vm1, %v2485_v38, 0.0 }
 0x241   :  { %v2491_v61 = vpop.eup %1696  ;;  %1700 = vpow2.f32 %v803_v25  ;;  %883 = vadd.xlane.f32.xlu1 %v882_v32  ;;  %v807_v36 = vmul.f32 1.442695, %v749_v23 }
 0x242   :  { %v888_v40 = vsel %vm626_vm1, %v2491_v61, 0.0  ;;  %v2498_v59 = vpop.eup %1698  ;;  %v722_v15 = vpop.xlane.xlu0 %721 }
 0x243   :  { %877 = vadd.xlane.f32.xlu2 %v876_v11  ;;  %889 = vadd.xlane.f32.xlu0 %v888_v40  ;;  %1702 = vpow2.f32 %v807_v36  ;;  %v754_v8 = vsub.f32 %v2357_v14, %v722_v15 }
 0x244   :  { %v710_v35 = vpop.xlane.xlu2 %709  ;;  %1704 = vpow2.f32 %v811_v18 }
 0x245   :  { %v750_v49 = vsub.f32 %v2360_v6, %v710_v35  ;;  %v885_v6 = vsel %vm626_vm1, %v2498_v59, 0.0  ;;  %v817_v5 = vmul.f32 1.442695, %v754_v8 }
 0x246   :  { %v716_v3 = vpop.xlane.xlu1 %715 }
 0x247   :  { %v2500_v52 = vpop.eup %1700  ;;  %v809_v55 = vmul.f32 1.442695, %v750_v49  ;;  %v752_v4 = vsub.f32 %v2365_v26, %v716_v3 }
 0x248   :  { %v891_v21 = vsel %vm626_vm1, %v2500_v52, 0.0 }
 0x249   :  { %1706 = vpow2.f32 %v809_v55  ;;  %892 = vadd.xlane.f32.xlu1 %v891_v21  ;;  %v813_v62 = vmul.f32 1.442695, %v752_v4  ;;  %v2508_v41 = vpop.eup %1702 }
 0x24a   :  { %v2510_v7 = vpop.eup %1704  ;;  %v897_v14 = vsel %vm626_vm1, %v2508_v41, 0.0 }
 0x24b   :  { %886 = vadd.xlane.f32.xlu2 %v885_v6  ;;  %1708 = vpow2.f32 %v813_v62  ;;  %v903_v28 = vsel %vm626_vm1, %v2510_v7, 0.0 }
 0x24c   :  { %1710 = vpow2.f32 %v817_v5 }
 0x24d   :  { %1712 = vpow2.f32 %v805_v33 }
 0x24f   :  { %v2512_v0 = vpop.eup %1706 }
 0x250   :  { %v900_v26 = vsel %vm626_vm1, %v2512_v0, 0.0 }
 0x251   :  { %901 = vadd.xlane.f32.xlu0 %v900_v26  ;;  %898 = vadd.xlane.f32.xlu1 %v897_v14  ;;  %v2522_v48 = vpop.eup %1708 }
 0x252   :  { %v2524_v58 = vpop.eup %1710  ;;  %v906_v12 = vsel %vm626_vm1, %v2522_v48, 0.0 }
 0x253   :  { %904 = vadd.xlane.f32.xlu2 %v903_v28  ;;  %v912_v27 = vsel %vm626_vm1, %v2524_v58, 0.0  ;;  %v2530_v45 = vpop.eup %1712 }
 0x254   :  { %v894_v20 = vsel %vm626_vm1, %v2530_v45, 0.0 }
 0x259   :  { %907 = vadd.xlane.f32.xlu1 %v906_v12  ;;  %v863_v39 = vpop.xlane.xlu0 %862 }
 0x25b   :  { %913 = vadd.xlane.f32.xlu2 %v912_v27 }
 0x25f   :  { %v821_v42 = vpop.xlane.xlu1 %820 }
 0x261   :  { %v2534_v37 = vpop.xlane.xlu0 %910 }
 0x263   :  { %895 = vadd.xlane.f32.xlu2 %v894_v20 }
 0x269   :  { %v827_v23 = vpop.xlane.xlu0 %826 }
 0x284   :  { %v830_v25 = vpop.xlane.xlu1 %829 }
 0x286   :  { %v824_v9 = vpop.xlane.xlu2 %823 }
 0x287   :  { %1714 = vrcp.f32 %v824_v9 }
 0x28c   :  { %v839_v32 = vpop.xlane.xlu1 %838 }
 0x28d   :  { %1716 = vrcp.f32 %v839_v32  ;;  %v1715_v36 = vpop.eup %1714 }
 0x28e   :  { %1718 = vrcp.f32 %v827_v23  ;;  %v833_v11 = vpop.xlane.xlu2 %832  ;;  %v836_v40 = vpop.xlane.xlu0 %835  ;;  %v948_v18 = vmul.f32 %v1715_v36, %v2401_v46 }
 0x28f   :  { %1720 = vrcp.f32 %v833_v11 }
 0x290   :  { %1722 = vrcp.f32 %v836_v40  ;;  %v1205_v21 = vrot.slane %v948_v18, 4 }
 0x291   :  { %1724 = vrcp.f32 %v830_v25 }
 0x292   :  { %1726 = vrcp.f32 %v821_v42 }
 0x293   :  { %v1717_v35 = vpop.eup %1716  ;;  %1728 = vrcp.f32 %v863_v39 }
 0x294   :  { %v1719_v49 = vpop.eup %1718  ;;  %v2538_v15 = vmul.f32 %v1717_v35, %v2408_v47  ;;  %v848_v3 = vpop.xlane.xlu1 %847 }
 0x295   :  { %v1721_v55 = vpop.eup %1720  ;;  %v949_v14 = vmul.f32 %v1719_v49, %v2387_v16 }
 0x296   :  { %v1723_v4 = vpop.eup %1722  ;;  %v842_v8 = vpop.xlane.xlu2 %841  ;;  %v991_v5 = vrot.slane %v2538_v15, 4  ;;  %v2542_v26 = vmul.f32 %v1721_v55, %v2406_v13 }
 0x297   :  { %v845_v6 = vpop.xlane.xlu0 %844  ;;  %v1725_v62 = vpop.eup %1724  ;;  %v952_v46 = vmul.f32 %v1723_v4, %v2414_v22  ;;  %1730 = vrcp.f32 %v842_v8 }
 0x298   :  { %v1727_v28 = vpop.eup %1726  ;;  %v950_v33 = vmul.f32 %v1725_v62, %v2395_v31  ;;  %v992_v12 = vsel %vm178_vm0, %v991_v5, %v949_v14  ;;  %v979_v27 = vrot.slane %v2542_v26, 4  ;;  %1732 = vrcp.f32 %v845_v6 }
 0x299   :  { %v1203_v47 = vrot.slane %v952_v46, 4  ;;  %v1206_v50 = vsel %vm178_vm0, %v952_v46, %v1205_v21  ;;  %v1729_v39 = vpop.eup %1728  ;;  %v947_v22 = vmul.f32 %v1727_v28, %v2381_v54  ;;  %v998_v32 = vperm.slane %v992_v12, %v1970_v29 }
 0x29a   :  { %v1214_v16 = vperm.slane %v1206_v50, %v1970_v29  ;;  %v1217_v25 = vrot.slane %v950_v33, 4  ;;  %v961_v36 = vmul.f32 %v1729_v39, %v2374_v51  ;;  %v993_v50 = vrot.slane %v949_v14, 4 }
 0x29b   :  { %v1204_v20 = vsel %vm178_vm0, %v1203_v47, %v948_v18  ;;  %v980_v11 = vsel %vm178_vm0, %v979_v27, %v947_v22  ;;  %v1027_v4 = vrot.slane %v998_v32, 4  ;;  %v981_v47 = vrot.slane %v947_v22, 4 }
 0x29c   :  { %v857_v13 = vpop.xlane.xlu1 %856  ;;  %v1210_v40 = vperm.slane %v1204_v20, %v1970_v29  ;;  %v1265_v49 = vrot.slane %v1214_v16, 4  ;;  %v1015_v46 = vrot.slane %v961_v36, 4 }
 0x29d   :  { %v1731_v42 = vpop.eup %1730  ;;  %1734 = vrcp.f32 %v857_v13  ;;  %v994_v13 = vsel %vm178_vm0, %v2538_v15, %v993_v50 }
 0x29e   :  { %v954_v23 = vmul.f32 %v1731_v42, %v2421_v24  ;;  %v851_v9 = vpop.xlane.xlu2 %850  ;;  %v1733_v55 = vpop.eup %1732  ;;  %v986_v24 = vperm.slane %v980_v11, %v1970_v29  ;;  %v1253_v62 = vrot.slane %v1210_v40, 4 }
 0x29f   :  { %v854_v31 = vpop.xlane.xlu0 %853  ;;  %1736 = vrcp.f32 %v851_v9  ;;  %v955_v42 = vmul.f32 %v1733_v55, %v2429_v19 }
 0x2a0   :  { %v1215_v18 = vrot.slane %v954_v23, 4  ;;  %v1218_v54 = vsel %vm178_vm0, %v954_v23, %v1217_v25  ;;  %1738 = vrcp.f32 %v854_v31  ;;  %v1028_v25 = vsel %vm178_vm0, %v1027_v4, %v986_v24 }
 0x2a1   :  { %v1226_v35 = vperm.slane %v1218_v54, %v1970_v29  ;;  %1740 = vrcp.f32 %v848_v3  ;;  %v1029_v23 = vrot.slane %v986_v24, 4  ;;  %v1005_v24 = vrot.slane %v955_v42, 4 }
 0x2a2   :  { %v1216_v21 = vsel %vm178_vm0, %v1215_v18, %v950_v33 }
 0x2a3   :  { %v1735_v8 = vpop.eup %1734  ;;  %v1222_v6 = vperm.slane %v1216_v21, %v1970_v29  ;;  %v1263_v5 = vrot.slane %v1226_v35, 4  ;;  %v2564_v51 = vsel %vm178_vm0, %v1226_v35, %v1265_v49  ;;  %v982_v35 = vsel %vm178_vm0, %v2542_v26, %v981_v47 }
 0x2a4   :  { %v959_v28 = vmul.f32 %v1735_v8, %v2438_v30  ;;  %v866_v12 = vpop.xlane.xlu1 %865  ;;  %v2591_v49 = vperm.slane %v1028_v25, %v2011_v10 }
 0x2a5   :  { %v1737_v3 = vpop.eup %1736  ;;  %1742 = vrcp.f32 %v866_v12  ;;  %v2568_v27 = vsel %vm178_vm0, %v1222_v6, %v1253_v62  ;;  %v1251_v33 = vrot.slane %v1222_v6, 4  ;;  %v2571_v20 = vsel %vm178_vm0, %v1263_v5, %v1214_v16 }
 0x2a6   :  { %v1739_v39 = vpop.eup %1738  ;;  %v1003_v22 = vrot.slane %v959_v28, 4  ;;  %v957_v14 = vmul.f32 %v1737_v3, %v2436_v60  ;;  %v860_v30 = vpop.xlane.xlu2 %859  ;;  %v2585_v60 = vperm.slane %v994_v13, %v1970_v29  ;;  %v1006_v47 = vsel %vm178_vm0, %v959_v28, %v1005_v24 }
 0x2a7   :  { %1744 = vrcp.f32 %v860_v30  ;;  %v1252_v9 = vsel %vm178_vm0, %v1251_v33, %v1210_v40  ;;  %v1741_v31 = vpop.eup %1740  ;;  %v958_v18 = vmul.f32 %v1739_v39, %v2444_v2  ;;  %v2598_v5 = vpop.xlane.xlu0 %871  ;;  %v2615_v28 = vperm.slane %v982_v35, %v1970_v29 }
 0x2a8   :  { %v1016_v16 = vsel %vm178_vm0, %v1015_v46, %v957_v14  ;;  %v1017_v11 = vrot.slane %v957_v14, 4  ;;  %v1004_v15 = vsel %vm178_vm0, %v1003_v22, %v955_v42  ;;  %v956_v8 = vmul.f32 %v1741_v31, %v2423_v17 }
 0x2a9   :  { %v1010_v19 = vperm.slane %v1004_v15, %v1970_v29  ;;  %v1022_v54 = vperm.slane %v1016_v16, %v1970_v29  ;;  %v1241_v6 = vrot.slane %v958_v18, 4  ;;  %v1039_v22 = vrot.slane %v2585_v60, 4 }
 0x2aa   :  { %v1018_v40 = vsel %vm178_vm0, %v961_v36, %v1017_v11  ;;  %v1030_v36 = vsel %vm178_vm0, %v998_v32, %v1029_v23  ;;  %v1077_v32 = vrot.slane %v2591_v49, 4  ;;  %v1229_v14 = vrot.slane %v956_v8, 4 }
 0x2ab   :  { %v1743_v55 = vpop.eup %1742  ;;  %v2594_v2 = vperm.slane %v1018_v40, %v1970_v29  ;;  %v1051_v4 = vrot.slane %v1022_v54, 4  ;;  %v1053_v21 = vrot.slane %v1010_v19, 4  ;;  %v2619_v30 = vperm.slane %v1006_v47, %v1970_v29 }
 0x2ac   :  { %v962_v62 = vmul.f32 %v1743_v55, %v2453_v63  ;;  %v875_v26 = vpop.xlane.xlu1 %874  ;;  %v1258_v47 = vperm.slane %v1252_v9, %v2011_v10 }
 0x2ad   :  { %v1745_v46 = vpop.eup %1744  ;;  %v1052_v50 = vsel %vm178_vm0, %v1051_v4, %v1010_v19  ;;  %v1054_v12 = vsel %vm178_vm0, %v1022_v54, %v1053_v21  ;;  %v1063_v3 = vrot.slane %v2594_v2, 4  ;;  %v1262_v4 = vperm.slane %v2568_v27, %v2011_v10 }
 0x2ae   :  { %v1239_v33 = vrot.slane %v962_v62, 4  ;;  %v1242_v17 = vsel %vm178_vm0, %v962_v62, %v1241_v6  ;;  %v960_v39 = vmul.f32 %v1745_v46, %v2451_v53  ;;  %v869_v63 = vpop.xlane.xlu2 %868  ;;  %v2608_v13 = vperm.slane %v1052_v50, %v2011_v10 }
 0x2af   :  { %v2612_v42 = vperm.slane %v1054_v12, %v2011_v10  ;;  %v2622_v53 = vperm.slane %v1030_v36, %v2011_v10  ;;  %v1250_v31 = vperm.slane %v1242_v17, %v1970_v29  ;;  %v1064_v54 = vsel %vm178_vm0, %v1063_v3, %v2619_v30  ;;  %v881_v62 = vpop.xlane.xlu0 %880 }
 0x2b0   :  { %v1227_v25 = vrot.slane %v960_v39, 4  ;;  %v1240_v23 = vsel %vm178_vm0, %v1239_v33, %v958_v18  ;;  %v1078_v16 = vsel %vm178_vm0, %v2608_v13, %v1077_v32  ;;  %v1230_v19 = vsel %vm178_vm0, %v960_v39, %v1229_v14 }
 0x2b1   :  { %v1079_v11 = vrot.slane %v2612_v42, 4  ;;  %1429 = vrot.lane.b32.xlu0 %v1078_v16, %s1858_s18  ;;  %v2638_v40 = vperm.slane %v1064_v54, %v2011_v10  ;;  %v1246_v24 = vperm.slane %v1240_v23, %v1970_v29  ;;  %v1040_v21 = vsel %vm178_vm0, %v1039_v22, %v2615_v28 }
 0x2b2   :  { %v1228_v15 = vsel %vm178_vm0, %v1227_v25, %v956_v8  ;;  %v1238_v8 = vperm.slane %v1230_v19, %v1970_v29  ;;  %v1287_v6 = vrot.slane %v1250_v31, 4  ;;  %v1270_v3 = vperm.slane %v2571_v20, %v2011_v10 }
 0x2b3   :  { %v1234_v35 = vperm.slane %v1228_v15, %v1970_v29  ;;  %v1080_v18 = vsel %vm178_vm0, %v1079_v11, %v2622_v53  ;;  %v1083_v50 = vrot.slane %v2638_v40, 4  ;;  %v1275_v12 = vrot.slane %v1246_v24, 4 }
 0x2b4   :  { %1437 = vrot.lane.b32.xlu2 %v1080_v18, %s1872_s3  ;;  %v2641_v55 = vpop.xlane.xlu1 %883  ;;  %1746 = vrcp.f32 %v875_v26  ;;  %v2656_v27 = vperm.slane %v1040_v21, %v2011_v10  ;;  %v1305_v17 = vrot.slane %v1262_v4, 4  ;;  %v1288_v9 = vsel %vm178_vm0, %v1287_v6, %v1238_v8 }
 0x2b5   :  { %v1277_v46 = vrot.slane %v1234_v35, 4  ;;  %1748 = vrcp.f32 %v881_v62  ;;  %v1276_v32 = vsel %vm178_vm0, %v1275_v12, %v1234_v35  ;;  %v1301_v14 = vrot.slane %v1258_v47, 4 }
 0x2b6   :  { %v2649_v36 = vpop.xlane.xlu2 %877  ;;  %1750 = vrcp.f32 %v869_v63  ;;  %v1282_v22 = vperm.slane %v1276_v32, %v2011_v10  ;;  %v1294_v20 = vperm.slane %v1288_v9, %v2011_v10  ;;  %v1084_v26 = vsel %vm178_vm0, %v1083_v50, %v2656_v27 }
 0x2b7   :  { %v1278_v33 = vsel %vm178_vm0, %v1246_v24, %v1277_v46  ;;  %v1309_v23 = vrot.slane %v1270_v3, 4  ;;  %v1289_v63 = vrot.slane %v1238_v8, 4  ;;  %v1274_v18 = vperm.slane %v2564_v51, %v2011_v10  ;;  %v890_v12 = vpop.xlane.xlu0 %889 }
 0x2b8   :  { %v1286_v39 = vperm.slane %v1278_v33, %v2011_v10  ;;  %v1299_v15 = vrot.slane %v1282_v22, 4  ;;  %v2671_v19 = vsel %vm178_vm0, %v1282_v22, %v1301_v14  ;;  %1752 = vrcp.f32 %v2534_v37 }
 0x2b9   :  { %v2677_v35 = vsel %vm178_vm0, %v1294_v20, %v1309_v23  ;;  %v1075_v21 = vrot.slane %v2608_v13, 4  ;;  %v1290_v50 = vsel %vm178_vm0, %v1250_v31, %v1289_v63  ;;  %v1313_v51 = vrot.slane %v1274_v18, 4 }
 0x2ba   :  { %v1303_v25 = vrot.slane %v1286_v39, 4  ;;  %v2667_v16 = vsel %vm178_vm0, %v1286_v39, %v1305_v17  ;;  %v1747_v24 = vpop.eup %1746  ;;  %v2684_v46 = vsel %vm178_vm0, %v1299_v15, %v1258_v47  ;;  %v1298_v33 = vperm.slane %v1290_v50, %v2011_v10 }
 0x2bb   :  { %v1749_v62 = vpop.eup %1748  ;;  %v965_v17 = vmul.f32 %v1747_v24, %v2470_v1  ;;  %v2695_v47 = vsel %vm178_vm0, %v1075_v21, %v2591_v49 }
 0x2bc   :  { %1453 = vrot.lane.b32.xlu2 %v1084_v26, %s1871_s30  ;;  %v893_v11 = vpop.xlane.xlu1 %892  ;;  %v2674_v54 = vsel %vm178_vm0, %v1303_v25, %v1262_v4  ;;  %v1751_v8 = vpop.eup %1750  ;;  %v1307_v4 = vrot.slane %v1294_v20, 4  ;;  %v967_v37 = vmul.f32 %v1749_v62, %v2476_v56  ;;  %v1311_v32 = vrot.slane %v1298_v33, 4 }
 0x2bd   :  { %v963_v39 = vmul.f32 %v1751_v8, %v2468_v43  ;;  %v2699_v22 = vsel %vm178_vm0, %v1298_v33, %v1313_v51  ;;  %v1105_v56 = vrot.slane %v965_v17, 4 }
 0x2be   :  { %v887_v6 = vpop.xlane.xlu2 %886  ;;  %v2691_v13 = vsel %vm178_vm0, %v1307_v4, %v1270_v3  ;;  %v1753_v31 = vpop.eup %1752  ;;  %v2702_v1 = vsel %vm178_vm0, %v1311_v32, %v1274_v18  ;;  %v1091_v3 = vrot.slane %v967_v37, 4  ;;  %v1041_v18 = vrot.slane %v2615_v28, 4 }
 0x2bf   :  { %1754 = vrcp.f32 %v887_v6  ;;  %v1093_v25 = vrot.slane %v963_v39, 4  ;;  %v977_v43 = vmul.f32 %v1753_v31, %v2379_v57 }
 0x2c0   :  { %1756 = vrcp.f32 %v893_v11  ;;  %v1092_v6 = vsel %vm178_vm0, %v1091_v3, %v963_v39  ;;  %v1042_v32 = vsel %vm178_vm0, %v2585_v60, %v1041_v18 }
 0x2c1   :  { %1758 = vrcp.f32 %v890_v12  ;;  %v1094_v57 = vsel %vm178_vm0, %v967_v37, %v1093_v25  ;;  %v1127_v4 = vrot.slane %v977_v43, 4  ;;  %v1098_v12 = vperm.slane %v1092_v6, %v1970_v29 }
 0x2c4   :  { %v899_v9 = vpop.xlane.xlu1 %898  ;;  %v902_v63 = vpop.xlane.xlu0 %901 }
 0x2c5   :  { %v1755_v14 = vpop.eup %1754  ;;  %1760 = vrcp.f32 %v899_v9 }
 0x2c6   :  { %v969_v20 = vmul.f32 %v1755_v14, %v2498_v59  ;;  %v905_v49 = vpop.xlane.xlu2 %904  ;;  %v1757_v26 = vpop.eup %1756 }
 0x2c7   :  { %1762 = vrcp.f32 %v905_v49  ;;  %v1759_v24 = vpop.eup %1758  ;;  %v971_v59 = vmul.f32 %v1757_v26, %v2500_v52 }
 0x2c8   :  { %v1103_v23 = vrot.slane %v969_v20, 4  ;;  %v1106_v11 = vsel %vm178_vm0, %v969_v20, %v1105_v56  ;;  %1764 = vrcp.f32 %v2649_v36  ;;  %v2722_v36 = vmul.f32 %v1759_v24, %v2491_v61 }
 0x2c9   :  { %v2708_v15 = vperm.slane %v1106_v11, %v1970_v29  ;;  %1766 = vrcp.f32 %v2641_v55  ;;  %v2728_v55 = vperm.slane %v1094_v57, %v1970_v29  ;;  %v1117_v51 = vrot.slane %v971_v59, 4 }
 0x2ca   :  { %v1104_v21 = vsel %vm178_vm0, %v1103_v23, %v965_v17  ;;  %1768 = vrcp.f32 %v902_v63  ;;  %v1327_v20 = vrot.slane %v2722_v36, 4  ;;  %v1065_v11 = vrot.slane %v2619_v30, 4 }
 0x2cb   :  { %v2718_v62 = vperm.slane %v1104_v21, %v1970_v29  ;;  %v1761_v8 = vpop.eup %1760  ;;  %v1151_v28 = vrot.slane %v2708_v15, 4  ;;  %v1141_v57 = vrot.slane %v1098_v12, 4 }
 0x2cc   :  { %v973_v52 = vmul.f32 %v1761_v8, %v2508_v41  ;;  %v908_v37 = vpop.xlane.xlu1 %907 }
 0x2cd   :  { %v1763_v50 = vpop.eup %1762  ;;  %v1139_v33 = vrot.slane %v2718_v62, 4  ;;  %v1152_v56 = vsel %vm178_vm0, %v1151_v28, %v2728_v55 }
 0x2ce   :  { %v975_v17 = vmul.f32 %v1763_v50, %v2510_v7  ;;  %v914_v39 = vpop.xlane.xlu2 %913  ;;  %v1128_v61 = vsel %vm178_vm0, %v1127_v4, %v973_v52  ;;  %v1129_v31 = vrot.slane %v973_v52, 4  ;;  %v1765_v9 = vpop.eup %1764  ;;  %v2752_v18 = vperm.slane %v1152_v56, %v2011_v10 }
 0x2cf   :  { %1770 = vrcp.f32 %v914_v39  ;;  %v1140_v41 = vsel %vm178_vm0, %v1139_v33, %v1098_v12  ;;  %v1134_v7 = vperm.slane %v1128_v61, %v1970_v29  ;;  %v1767_v3 = vpop.eup %1766  ;;  %v2749_v63 = vmul.f32 %v1765_v9, %v2483_v34 }
 0x2d0   :  { %1772 = vrcp.f32 %v2598_v5  ;;  %v1115_v14 = vrot.slane %v975_v17, 4  ;;  %v1130_v60 = vsel %vm178_vm0, %v977_v43, %v1129_v31  ;;  %v1118_v49 = vsel %vm178_vm0, %v975_v17, %v1117_v51  ;;  %v1769_v26 = vpop.eup %1768 }
 0x2d1   :  { %1774 = vrcp.f32 %v908_v37  ;;  %v2743_v25 = vperm.slane %v1130_v60, %v1970_v29  ;;  %v1146_v23 = vperm.slane %v1140_v41, %v2011_v10  ;;  %v1163_v24 = vrot.slane %v1134_v7, 4 }
 0x2d2   :  { %v1116_v5 = vsel %vm178_vm0, %v1115_v14, %v971_v59  ;;  %v2756_v21 = vmul.f32 %v1767_v3, %v2485_v38  ;;  %v2759_v6 = vperm.slane %v1118_v49, %v1970_v29  ;;  %v1328_v34 = vsel %vm178_vm0, %v1327_v20, %v2749_v63 }
 0x2d3   :  { %v1122_v43 = vperm.slane %v1116_v5, %v1970_v29  ;;  %v1175_v59 = vrot.slane %v2743_v25, 4  ;;  %v2765_v30 = vmul.f32 %v1769_v26, %v2512_v0  ;;  %v1189_v51 = vrot.slane %v1146_v23, 4 }
 0x2d4   :  { %v1197_v0 = vrot.slane %v2752_v18, 4  ;;  %v1142_v41 = vsel %vm178_vm0, %v2718_v62, %v1141_v57  ;;  %v1066_v56 = vsel %vm178_vm0, %v2594_v2, %v1065_v11  ;;  %v1315_v3 = vrot.slane %v2756_v21, 4 }
 0x2d5   :  { %v1771_v8 = vpop.eup %1770  ;;  %v1164_v4 = vsel %vm178_vm0, %v1163_v24, %v1122_v43  ;;  %v1165_v28 = vrot.slane %v1122_v43, 4  ;;  %v1176_v33 = vsel %vm178_vm0, %v1175_v59, %v2759_v6  ;;  %v1150_v60 = vperm.slane %v1142_v41, %v2011_v10 }
 0x2d6   :  { %v1773_v50 = vpop.eup %1772  ;;  %v2769_v38 = vmul.f32 %v1771_v8, %v2524_v58  ;;  %v896_v52 = vpop.xlane.xlu2 %895  ;;  %v1170_v12 = vperm.slane %v1164_v4, %v2011_v10  ;;  %v1182_v37 = vperm.slane %v1176_v33, %v2011_v10  ;;  %v1050_v26 = vperm.slane %v1042_v32, %v2011_v10 }
 0x2d7   :  { %v1775_v17 = vpop.eup %1774  ;;  %1776 = vrcp.f32 %v896_v52  ;;  %v1166_v39 = vsel %vm178_vm0, %v1134_v7, %v1165_v28  ;;  %v1334_v5 = vperm.slane %v1328_v34, %v1970_v29  ;;  %v2798_v2 = vmul.f32 %v1773_v50, %v2459_v44 }
 0x2d8   :  { %v1351_v61 = vrot.slane %v2769_v38, 4  ;;  %v1190_v58 = vsel %vm178_vm0, %v1170_v12, %v1189_v51  ;;  %v1187_v31 = vrot.slane %v1170_v12, 4  ;;  %v1198_v9 = vsel %vm178_vm0, %v1182_v37, %v1197_v0 }
 0x2d9   :  { %1431 = vrot.lane.b32.xlu1 %v1190_v58, %s1858_s18  ;;  %v1174_v14 = vperm.slane %v1166_v39, %v2011_v10  ;;  %v976_v7 = vmul.f32 %v1775_v17, %v2522_v48  ;;  %1463 = vrot.lane.b32.xlu2 %v1198_v9, %s1869_s28  ;;  %v1074_v24 = vperm.slane %v1066_v56, %v2011_v10  ;;  %v1081_v57 = vrot.slane %v2622_v53, 4 }
 0x2da   :  { %v1352_v20 = vsel %vm178_vm0, %v1351_v61, %v2765_v30  ;;  %v2792_v62 = vsel %vm178_vm0, %v1187_v31, %v1146_v23  ;;  %v1316_v32 = vsel %vm178_vm0, %v1315_v3, %v2798_v2  ;;  %v1089_v8 = vrot.slane %v1050_v26, 4 }
 0x2db   :  { %v1191_v49 = vrot.slane %v1174_v14, 4  ;;  %v1358_v48 = vperm.slane %v1352_v20, %v1970_v29  ;;  %v1339_v59 = vrot.slane %v976_v7, 4  ;;  %v1363_v44 = vrot.slane %v1334_v5, 4 }
 0x2dc   :  { %v1082_v4 = vsel %vm178_vm0, %v2612_v42, %v1081_v57  ;;  %v1090_v50 = vsel %vm178_vm0, %v1074_v24, %v1089_v8  ;;  %v1193_v53 = vrot.slane %v1150_v60, 4  ;;  %v1195_v51 = vrot.slane %v1182_v37, 4 }
 0x2dd   :  { %v1777_v11 = vpop.eup %1776  ;;  %v1192_v43 = vsel %vm178_vm0, %v1191_v49, %v1150_v60  ;;  %v1387_v52 = vrot.slane %v1358_v48, 4  ;;  %v1177_v61 = vrot.slane %v2759_v6, 4  ;;  %v1085_v41 = vrot.slane %v2656_v27, 4 }
 0x2de   :  { %v972_v23 = vmul.f32 %v1777_v11, %v2530_v45  ;;  %1439 = vrot.lane.b32.xlu0 %v1192_v43, %s1872_s3  ;;  %v1322_v45 = vperm.slane %v1316_v32, %v1970_v29  ;;  %v1194_v42 = vsel %vm178_vm0, %v1174_v14, %v1193_v53  ;;  %v1196_v58 = vsel %vm178_vm0, %v1195_v51, %v2752_v18 }
 0x2df   :  { %v1178_v37 = vsel %vm178_vm0, %v2743_v25, %v1177_v61  ;;  %v1087_v9 = vrot.slane %v1074_v24, 4  ;;  %v1086_v56 = vsel %vm178_vm0, %v2638_v40, %v1085_v41  ;;  %v1153_v6 = vrot.slane %v2728_v55, 4 }
 0x2e0   :  { %v1340_v34 = vsel %vm178_vm0, %v1339_v59, %v972_v23  ;;  %v1364_v33 = vsel %vm178_vm0, %v1363_v44, %v1322_v45  ;;  %v1365_v14 = vrot.slane %v1322_v45, 4  ;;  %v1186_v18 = vperm.slane %v1178_v37, %v2011_v10 }
 0x2e1   :  { %v1346_v28 = vperm.slane %v1340_v34, %v1970_v29  ;;  %1445 = vrot.lane.b32.xlu1 %v1082_v4, %s1873_s4  ;;  %1477 = vrot.lane.b32.xlu2 %v1090_v50, %s1868_s27  ;;  %v1370_v0 = vperm.slane %v1364_v33, %v2011_v10  ;;  %v1341_v20 = vrot.slane %v972_v23, 4  ;;  %v1154_v60 = vsel %vm178_vm0, %v2708_v15, %v1153_v6 }
 0x2e2   :  { %v1088_v25 = vsel %vm178_vm0, %v1087_v9, %v1050_v26  ;;  %v1366_v27 = vsel %vm178_vm0, %v1334_v5, %v1365_v14  ;;  %v1199_v49 = vrot.slane %v1186_v18, 4  ;;  %v1162_v40 = vperm.slane %v1154_v60, %v2011_v10 }
 0x2e3   :  { %v1388_v12 = vsel %vm178_vm0, %v1387_v52, %v1346_v28  ;;  %v1389_v3 = vrot.slane %v1346_v28, 4  ;;  %v1342_v11 = vsel %vm178_vm0, %v976_v7, %v1341_v20  ;;  %v1374_v43 = vperm.slane %v1366_v27, %v2011_v10 }
 0x2e4   :  { %v1394_v17 = vperm.slane %v1388_v12, %v2011_v10  ;;  %v1200_v15 = vsel %vm178_vm0, %v1199_v49, %v1162_v40  ;;  %v1350_v5 = vperm.slane %v1342_v11, %v1970_v29  ;;  %v1201_v24 = vrot.slane %v1162_v40, 4 }
 0x2e5   :  { %v1390_v55 = vsel %vm178_vm0, %v1358_v48, %v1389_v3  ;;  %v1353_v59 = vrot.slane %v2765_v30, 4  ;;  %v1317_v48 = vrot.slane %v2798_v2, 4  ;;  %v1329_v7 = vrot.slane %v2749_v63, 4 }
 0x2e6   :  { %1447 = vrot.lane.b32.xlu0 %v1194_v42, %s1873_s4  ;;  %v1411_v39 = vrot.slane %v1394_v17, 4  ;;  %v1398_v26 = vperm.slane %v1390_v55, %v2011_v10  ;;  %v1202_v23 = vsel %vm178_vm0, %v1186_v18, %v1201_v24  ;;  %v1401_v8 = vrot.slane %v1350_v5, 4 }
 0x2e7   :  { %v1354_v57 = vsel %vm178_vm0, %v2769_v38, %v1353_v59  ;;  %v1318_v30 = vsel %vm178_vm0, %v2756_v21, %v1317_v48  ;;  %v1330_v2 = vsel %vm178_vm0, %v2722_v36, %v1329_v7  ;;  %v1413_v28 = vrot.slane %v1370_v0, 4 }
 0x2e8   :  { %v1412_v31 = vsel %vm178_vm0, %v1411_v39, %v1370_v0  ;;  %v1362_v44 = vperm.slane %v1354_v57, %v1970_v29  ;;  %v1326_v63 = vperm.slane %v1318_v30, %v1970_v29  ;;  %v1338_v34 = vperm.slane %v1330_v2, %v1970_v29 }
 0x2e9   :  { %1455 = vrot.lane.b32.xlu1 %v1196_v58, %s1871_s30  ;;  %1487 = vrot.lane.b32.xlu2 %v1412_v31, %s1866_s25  ;;  %v1415_v36 = vrot.slane %v1398_v26, 4  ;;  %v1414_v45 = vsel %vm178_vm0, %v1394_v17, %v1413_v28 }
 0x2ea   :  { %v1402_v38 = vsel %vm178_vm0, %v1362_v44, %v1401_v8  ;;  %v1377_v21 = vrot.slane %v1326_v63, 4  ;;  %v1375_v33 = vrot.slane %v1338_v34, 4 }
 0x2eb   :  { %v1410_v4 = vperm.slane %v1402_v38, %v2011_v10  ;;  %v1416_v52 = vsel %vm178_vm0, %v1415_v36, %v1374_v43 }
 0x2ec   :  { %v1378_v50 = vsel %vm178_vm0, %v1338_v34, %v1377_v21  ;;  %v1376_v51 = vsel %vm178_vm0, %v1375_v33, %v1326_v63 }
 0x2ed   :  { %v1386_v29 = vperm.slane %v1378_v50, %v2011_v10  ;;  %v1382_v42 = vperm.slane %v1376_v51, %v2011_v10 }
 0x2ee   :  { %1461 = vrot.lane.b32.xlu0 %v1086_v56, %s1869_s28 }
 0x2ef   :  { %v1421_v39 = vrot.slane %v1382_v42, 4 }
 0x2f1   :  { %1469 = vrot.lane.b32.xlu1 %v1088_v25, %s1870_s29  ;;  %1501 = vrot.lane.b32.xlu2 %v2674_v54, %s1865_s24  ;;  %v1417_v54 = vrot.slane %v1374_v43, 4 }
 0x2f3   :  { %v1418_v32 = vsel %vm178_vm0, %v1398_v26, %v1417_v54 }
 0x2f6   :  { %1471 = vrot.lane.b32.xlu0 %v1200_v15, %s1870_s29 }
 0x2f9   :  { %1479 = vrot.lane.b32.xlu1 %v1202_v23, %s1868_s27  ;;  %1511 = vrot.lane.b32.xlu2 %v1418_v32, %s1863_s22 }
 0x2fe   :  { %1485 = vrot.lane.b32.xlu0 %v2684_v46, %s1866_s25  ;;  %v1423_v46 = vrot.slane %v1410_v4, 4 }
 0x300   :  { %v1424_v53 = vsel %vm178_vm0, %v1423_v46, %v1386_v29 }
 0x301   :  { %1493 = vrot.lane.b32.xlu1 %v2671_v19, %s1867_s26  ;;  %1525 = vrot.lane.b32.xlu2 %v2677_v35, %s1860_s0  ;;  %v1399_v19 = vrot.slane %v1362_v44, 4 }
 0x303   :  { %v1400_v35 = vsel %vm178_vm0, %v1399_v19, %v1350_v5 }
 0x304   :  { %v1406_v12 = vperm.slane %v1400_v35, %v2011_v10 }
 0x306   :  { %1495 = vrot.lane.b32.xlu0 %v1414_v45, %s1867_s26  ;;  %v1419_v17 = vrot.slane %v1406_v12, 4  ;;  %v1422_v61 = vsel %vm178_vm0, %v1406_v12, %v1421_v39 }
 0x308   :  { %v1420_v0 = vsel %vm178_vm0, %v1419_v17, %v1382_v42 }
 0x309   :  { %1503 = vrot.lane.b32.xlu1 %v1416_v52, %s1865_s24  ;;  %1535 = vrot.lane.b32.xlu2 %v1424_v53, %s1861_s1 }
 0x30e   :  { %1509 = vrot.lane.b32.xlu0 %v2667_v16, %s1863_s22  ;;  %v1425_v16 = vrot.slane %v1386_v29, 4  ;;  %v1438_v58 = vpop.permute.xlu2 %1437 }
 0x311   :  { %1517 = vrot.lane.b32.xlu1 %v2691_v13, %s1864_s23  ;;  %v1426_v13 = vsel %vm178_vm0, %v1410_v4, %v1425_v16 }
 0x316   :  { %1519 = vrot.lane.b32.xlu0 %v1420_v0, %s1864_s23  ;;  %v1454_v41 = vpop.permute.xlu2 %1453 }
 0x319   :  { %1527 = vrot.lane.b32.xlu1 %v1422_v61, %s1860_s0 }
 0x31e   :  { %1533 = vrot.lane.b32.xlu0 %v2702_v1, %s1861_s1 }
 0x321   :  { %1541 = vrot.lane.b32.xlu1 %v2699_v22, %s1862_s21 }
 0x323   :  { %v1430_v10 = vpop.permute.xlu0 %1429 }
 0x324   :  { %v1547_v11 = vsel %vm626_vm1, %v2695_v47, %v1430_v10 }
 0x325   :  { %v1550_v43 = vsel %vm1549_vm2, %v1547_v11, %v1438_v58 }
 0x326   :  { %1543 = vrot.lane.b32.xlu0 %v1426_v13, %s1862_s21 }
 0x333   :  { %v1464_v56 = vpop.permute.xlu2 %1463 }
 0x33b   :  { %v1478_v1 = vpop.permute.xlu2 %1477 }
 0x343   :  { %v1488_v22 = vpop.permute.xlu2 %1487 }
 0x34b   :  { %v1432_v31 = vpop.permute.xlu1 %1431  ;;  %v1502_v40 = vpop.permute.xlu2 %1501 }
 0x34c   :  { %v1548_v5 = vsel %vm626_vm1, %v2792_v62, %v1432_v31 }
 0x350   :  { %v1440_v37 = vpop.permute.xlu0 %1439 }
 0x351   :  { %v1551_v23 = vsel %vm1549_vm2, %v1548_v5, %v1440_v37 }
 0x353   :  { %v1446_v9 = vpop.permute.xlu1 %1445  ;;  %v1512_v24 = vpop.permute.xlu2 %1511 }
 0x354   :  { %v1553_v15 = vsel %vm1552_vm3, %v1550_v43, %v1446_v9 }
 0x355   :  { %v1556_v59 = vsel %vm1555_vm4, %v1553_v15, %v1454_v41 }
 0x358   :  { %v1448_v14 = vpop.permute.xlu0 %1447 }
 0x359   :  { %v1554_v7 = vsel %vm1552_vm3, %v1551_v23, %v1448_v14 }
 0x35b   :  { %v1456_v6 = vpop.permute.xlu1 %1455  ;;  %v1526_v34 = vpop.permute.xlu2 %1525 }
 0x35c   :  { %v1557_v47 = vsel %vm1555_vm4, %v1554_v7, %v1456_v6 }
 0x35d   :  { %v1560_v30 = vsel %vm1558_vm6, %v1557_v47, %v1464_v56 }
 0x360   :  { %v1462_v18 = vpop.permute.xlu0 %1461 }
 0x361   :  { %v1559_v48 = vsel %vm1558_vm6, %v1556_v59, %v1462_v18 }
 0x363   :  { %v1470_v3 = vpop.permute.xlu1 %1469  ;;  %v1536_v51 = vpop.permute.xlu2 %1535 }
 0x364   :  { %v1562_v57 = vsel %vm1561_vm5, %v1559_v48, %v1470_v3 }
 0x365   :  { %v1565_v32 = vsel %vm1564_vm7, %v1562_v57, %v1478_v1 }
 0x368   :  { %v1472_v20 = vpop.permute.xlu0 %1471 }
 0x369   :  { %v1563_v2 = vsel %vm1561_vm5, %v1560_v30, %v1472_v20 }
 0x36b   :  { %v1480_v60 = vpop.permute.xlu1 %1479 }
 0x36c   :  { %v1566_v63 = vsel %vm1564_vm7, %v1563_v2, %v1480_v60 }
 0x36d   :  { %v1569_v21 = vsel %vm1567_vm9, %v1566_v63, %v1488_v22 }
 0x370   :  { %v1486_v25 = vpop.permute.xlu0 %1485 }
 0x371   :  { %v1568_v44 = vsel %vm1567_vm9, %v1565_v32, %v1486_v25 }
 0x373   :  { %v1494_v27 = vpop.permute.xlu1 %1493 }
 0x374   :  { %v1571_v62 = vsel %vm1570_vm8, %v1568_v44, %v1494_v27 }
 0x375   :  { %v1574_v4 = vsel %vm1573_vm10, %v1571_v62, %v1502_v40 }
 0x378   :  { %v1496_v49 = vpop.permute.xlu0 %1495 }
 0x379   :  { %v1572_v36 = vsel %vm1570_vm8, %v1569_v21, %v1496_v49 }
 0x37b   :  { %v1504_v55 = vpop.permute.xlu1 %1503 }
 0x37c   :  { %v1575_v45 = vsel %vm1573_vm10, %v1572_v36, %v1504_v55 }
 0x37d   :  { %v1578_v52 = vsel %vm1576_vm12, %v1575_v45, %v1512_v24 }
 0x380   :  { %v1510_v26 = vpop.permute.xlu0 %1509 }
 0x381   :  { %v1577_v28 = vsel %vm1576_vm12, %v1574_v4, %v1510_v26 }
 0x383   :  { %v1518_v54 = vpop.permute.xlu1 %1517 }
 0x384   :  { %v1580_v50 = vsel %vm1579_vm11, %v1577_v28, %v1518_v54 }
 0x385   :  { %v1583_v29 = vsel %vm1582_vm13, %v1580_v50, %v1526_v34 }
 0x388   :  { %v1520_v8 = vpop.permute.xlu0 %1519 }
 0x389   :  { %v1581_v35 = vsel %vm1579_vm11, %v1578_v52, %v1520_v8 }
 0x38b   :  { %v1528_v38 = vpop.permute.xlu1 %1527 }
 0x38c   :  { %v1584_v12 = vsel %vm1582_vm13, %v1581_v35, %v1528_v38 }
 0x38d   :  { %v1587_v42 = vsel %vm1585_vm15, %v1584_v12, %v1536_v51 }
 0x390   :  { %v1534_v46 = vpop.permute.xlu0 %1533 }
 0x391   :  { %v1586_v19 = vsel %vm1585_vm15, %v1583_v29, %v1534_v46 }
 0x393   :  { %v1542_v53 = vpop.permute.xlu1 %1541 }
 0x394   :  { %v1589_v33 = vsel %vm1588_vm14, %v1586_v19, %v1542_v53 }
 0x395   :  { %1591 = vst [vmem:[#allocation7] sm:$0xff] %v1589_v33 }
 0x398   :  { %v1544_v17 = vpop.permute.xlu0 %1543 }
 0x399   :  { %v1590_v0 = vsel %vm1588_vm14, %v1587_v42, %v1544_v17 }
 0x39a   :  { %1592 = vst [vmem:[#allocation7 + $0x8] sm:$0xff] %v1590_v0 }
 0x39b   :  { %1605 = dma.vmem_to_hbm [thread:$0]  %s1598_s6, 256, %s1600_s9, [#allocation4], %s1857_s17, %s1857_s17, %s1858_s18  }
 0x39c   :  { %1854 = dma.done.wait [#allocation4], 256  }
 0x39d   :  { %1855 = vsyncadd [#allocation4], 4294967040 }
 0x39e   :  { %1610 = vsyncpa [#allocation3], 1 }
 0x39f   :  { %1611 = vsyncpa [#allocation6], 1 }
 0x3a0   :  { %1612 = vsyncpa [#allocation4], 1 }

</bundles_post_ra>
